<compile_context>
chip_gen: v5e
topology: v5e:2x2
jax: 0.10.0
libtpu: 0.0.40
codegen_flags: <defaults>
</compile_context>

<pallas_src>
import functools

import jax
import jax.numpy as jnp
from jax.experimental import pallas as pl
from jax.experimental.pallas import tpu as pltpu


def _round_up(n, m):
    return ((n + m - 1) // m) * m


def _pick_tb(batch):
    """MXU-friendly batch tile: single tile for small B, 128/256 otherwise."""
    if batch <= 128:
        return _round_up(max(batch, 8), 8)   # one tile, sublane-aligned
    if batch <= 512:
        return 128                           # >=2 grid steps (megacore on v7x)
    return 256                               # matches v6e/v7x 256-wide MXU


def _vae_kernel(
    x_ref, eps_ref,
    w1_ref, b1_ref, w2_ref, b2_ref,
    wh_ref, bh_ref,
    wd1_ref, bd1_ref, wd2_ref, bd2_ref, wd3_ref, bd3_ref,
    dec_ref, head_ref,
    *, latent_dim,
):
    f32 = jnp.float32
    bf16 = jnp.bfloat16
    L = latent_dim

    x = x_ref[...].astype(bf16)

    # ---- encoder ----
    h = jnp.dot(x, w1_ref[...], preferred_element_type=f32) + b1_ref[...]
    h = jnp.maximum(h, 0.0).astype(bf16)
    h = jnp.dot(h, w2_ref[...], preferred_element_type=f32) + b2_ref[...]
    h = jnp.maximum(h, 0.0).astype(bf16)

    # ---- fused mu|logvar head (lane-padded to a multiple of 128) ----
    head = jnp.dot(h, wh_ref[...], preferred_element_type=f32) + bh_ref[...]
    mu = head[:, :L]
    logvar = head[:, L:2 * L]

    # ---- reparameterize: z = mu + eps * exp(0.5 * logvar)  (f32) ----
    z = (mu + eps_ref[...] * jnp.exp(0.5 * logvar)).astype(bf16)

    # ---- decoder ----
    d = jnp.dot(z, wd1_ref[...], preferred_element_type=f32) + bd1_ref[...]
    d = jnp.maximum(d, 0.0).astype(bf16)
    d = jnp.dot(d, wd2_ref[...], preferred_element_type=f32) + bd2_ref[...]
    d = jnp.maximum(d, 0.0).astype(bf16)
    d = jnp.dot(d, wd3_ref[...], preferred_element_type=f32) + bd3_ref[...]

    # Lane-dense (multiple-of-128) stores; padded columns are sliced off in
    # the wrapper.
    dec_ref[...] = jax.nn.sigmoid(d)
    head_ref[...] = head


def pack_params(params, input_dim, latent_dim):
    """Fuse mu|logvar heads, pad output lanes to 128, cast weights to bf16."""
    (w1, b1, w2, b2, wmu, bmu, wlv, blv,
     wd1, bd1, wd2, bd2, wd3, bd3) = params
    L = latent_dim
    Hp = _round_up(2 * L, 128)
    Dp = _round_up(input_dim, 128)

    wh = jnp.zeros((wmu.shape[0], Hp), jnp.float32)
    wh = wh.at[:, :L].set(wmu).at[:, L:2 * L].set(wlv)
    bh = jnp.zeros((1, Hp), jnp.float32)
    bh = bh.at[:, :L].set(bmu).at[:, L:2 * L].set(blv)

    wd3p = jnp.zeros((wd3.shape[0], Dp), jnp.float32).at[:, :input_dim].set(wd3)
    bd3p = jnp.zeros((1, Dp), jnp.float32).at[:, :input_dim].set(bd3)

    bf = lambda w: w.astype(jnp.bfloat16)   # weights bf16, biases stay f32
    return (bf(w1), b1, bf(w2), b2, bf(wh), bh,
            bf(wd1), bd1, bf(wd2), bd2, bf(wd3p), bd3p)


@functools.partial(jax.jit, static_argnames=("latent_dim", "tb"))
def vae_forward(x, eps, packed_params, latent_dim, tb=None):
    """Fused VAE forward. x: [B, D], eps: [B, L] -> (decoded, mu, logvar)."""
    B, D = x.shape
    L = latent_dim
    if tb is None:
        tb = _pick_tb(B)
    Hp = _round_up(2 * L, 128)
    Dp = _round_up(D, 128)

    num_tiles = pl.cdiv(B, tb)
    Bp = num_tiles * tb
    if Bp != B:  # zero-pad the trailing batch rows; sliced off below
        x = jnp.pad(x, ((0, Bp - B), (0, 0)))
        eps = jnp.pad(eps, ((0, Bp - B), (0, 0)))

    (w1, b1, w2, b2, wh, bh, wd1, bd1, wd2, bd2, wd3, bd3) = packed_params

    row_map = lambda i: (i, 0)
    const_map = lambda i: (0, 0)

    # NOTE: these constant-index weight specs could use pl.Buffered(1) to drop
    # the redundant second buffer; weight footprint (~260 KB bf16) is far below
    # VMEM limits on all generations, so it is left at the default.
    weight_specs = [
        pl.BlockSpec(w.shape, const_map)
        for w in (w1, b1, w2, b2, wh, bh, wd1, bd1, wd2, bd2, wd3, bd3)
    ]

    kernel = functools.partial(_vae_kernel, latent_dim=L)

    dec_p, head_p = pl.pallas_call(
        kernel,
        out_shape=(
            jax.ShapeDtypeStruct((Bp, Dp), jnp.float32),   # decoded (lane-padded)
            jax.ShapeDtypeStruct((Bp, Hp), jnp.float32),   # mu|logvar (lane-padded)
        ),
        grid_spec=pltpu.PrefetchScalarGridSpec(
            num_scalar_prefetch=0,
            grid=(num_tiles,),
            in_specs=[
                pl.BlockSpec((tb, D), row_map),
                pl.BlockSpec((tb, L), row_map),
            ] + weight_specs,
            out_specs=[
                pl.BlockSpec((tb, Dp), row_map),
                pl.BlockSpec((tb, Hp), row_map),
            ],
        ),
        compiler_params=pltpu.CompilerParams(
            dimension_semantics=("parallel",),
        ),
    )(x, eps, w1, b1, w2, b2, wh, bh, wd1, bd1, wd2, bd2, wd3, bd3)

    decoded = dec_p[:B, :D]
    mu = head_p[:B, :L]
    logvar = head_p[:B, L:2 * L]
    return decoded, mu, logvar


def init_params(key, input_dim, latent_dim):
    """PyTorch-default-style Linear params, stored as (W[in,out], b[1,out])."""
    dims = [
        (input_dim, 256),   # encoder[0]
        (256, 128),         # encoder[2]
        (128, latent_dim),  # mu_layer
        (128, latent_dim),  # logvar_layer
        (latent_dim, 128),  # decoder[0]
        (128, 256),         # decoder[2]
        (256, input_dim),   # decoder[4]
    ]
    params = []
    for fan_in, fan_out in dims:
        key, kw, kb = jax.random.split(key, 3)
        bound = 1.0 / jnp.sqrt(fan_in)
        w = jax.random.uniform(kw, (fan_in, fan_out), jnp.float32, -bound, bound)
        b = jax.random.uniform(kb, (1, fan_out), jnp.float32, -bound, bound)
        params += [w, b]
    return tuple(params)


def vae_reference(x, eps, params):
    """Pure-JAX reference with the same bf16-matmul / f32-elementwise numerics."""
    (w1, b1, w2, b2, wmu, bmu, wlv, blv,
     wd1, bd1, wd2, bd2, wd3, bd3) = params

    def lin(a, w, b):
        return jnp.dot(a.astype(jnp.bfloat16), w.astype(jnp.bfloat16),
                       preferred_element_type=jnp.float32) + b

    h = jnp.maximum(lin(x, w1, b1), 0.0)
    h = jnp.maximum(lin(h, w2, b2), 0.0)
    mu = lin(h, wmu, bmu)
    logvar = lin(h, wlv, blv)
    z = mu + eps * jnp.exp(0.5 * logvar)
    d = jnp.maximum(lin(z, wd1, bd1), 0.0)
    d = jnp.maximum(lin(d, wd2, bd2), 0.0)
    dec = jax.nn.sigmoid(lin(d, wd3, bd3))
    return dec, mu, logvar


if __name__ == "__main__":
    INPUT_DIM = 64
    LATENT_DIM = 16
    BATCH = 200   # deliberately not a tile multiple: exercises cdiv + padding

    key = jax.random.PRNGKey(0)
    k_param, k_x, k_eps = jax.random.split(key, 3)

    params = init_params(k_param, INPUT_DIM, LATENT_DIM)
    packed = pack_params(params, INPUT_DIM, LATENT_DIM)

    x = jax.random.uniform(k_x, (BATCH, INPUT_DIM), jnp.float32)
    # eps plays the role of torch.randn_like(std) in reparameterize().
    eps = jax.random.normal(k_eps, (BATCH, LATENT_DIM), jnp.float32)

    decoded, mu, logvar = vae_forward(x, eps, packed, latent_dim=LATENT_DIM)
    jax.block_until_ready((decoded, mu, logvar))

    ref_dec, ref_mu, ref_lv = vae_reference(x, eps, params)
    assert decoded.shape == (BATCH, INPUT_DIM)
    assert mu.shape == (BATCH, LATENT_DIM)
    assert logvar.shape == (BATCH, LATENT_DIM)
    assert jnp.allclose(decoded, ref_dec, atol=2e-3, rtol=2e-3)
    assert jnp.allclose(mu, ref_mu, atol=2e-3, rtol=2e-3)
    assert jnp.allclose(logvar, ref_lv, atol=2e-3, rtol=2e-3)

    print("KERNEL_OK")
</pallas_src>

<mosaic_0001>
module attributes {stable_mosaic.version = 11 : i64} {
  func.func @_vae_kernel(%arg0: i32, %arg1: memref<128x64xf32, #tpu.memory_space<vmem>>, %arg2: memref<128x16xf32, #tpu.memory_space<vmem>>, %arg3: memref<64x256xbf16, #tpu.memory_space<vmem>>, %arg4: memref<1x256xf32, #tpu.memory_space<vmem>>, %arg5: memref<256x128xbf16, #tpu.memory_space<vmem>>, %arg6: memref<1x128xf32, #tpu.memory_space<vmem>>, %arg7: memref<128x128xbf16, #tpu.memory_space<vmem>>, %arg8: memref<1x128xf32, #tpu.memory_space<vmem>>, %arg9: memref<16x128xbf16, #tpu.memory_space<vmem>>, %arg10: memref<1x128xf32, #tpu.memory_space<vmem>>, %arg11: memref<128x256xbf16, #tpu.memory_space<vmem>>, %arg12: memref<1x256xf32, #tpu.memory_space<vmem>>, %arg13: memref<256x128xbf16, #tpu.memory_space<vmem>>, %arg14: memref<1x128xf32, #tpu.memory_space<vmem>>, %arg15: memref<128x128xf32, #tpu.memory_space<vmem>>, %arg16: memref<128x128xf32, #tpu.memory_space<vmem>>) attributes {dimension_semantics = [#tpu.dimension_semantics<parallel>], iteration_bounds = array<i64: 2>, scalar_prefetch = 0 : i64, scratch_operands = 0 : i64, tpu.core_type = #tpu.core_type<tc>, window_params = [{transform_indices = @transform_0, window_bounds = array<i64: 128, 64>}, {transform_indices = @transform_1, window_bounds = array<i64: 128, 16>}, {pipeline_mode = #tpu.pipeline_mode<synchronous>, transform_indices = @transform_2, window_bounds = array<i64: 64, 256>}, {pipeline_mode = #tpu.pipeline_mode<synchronous>, transform_indices = @transform_3, window_bounds = array<i64: 1, 256>}, {pipeline_mode = #tpu.pipeline_mode<synchronous>, transform_indices = @transform_4, window_bounds = array<i64: 256, 128>}, {pipeline_mode = #tpu.pipeline_mode<synchronous>, transform_indices = @transform_5, window_bounds = array<i64: 1, 128>}, {pipeline_mode = #tpu.pipeline_mode<synchronous>, transform_indices = @transform_6, window_bounds = array<i64: 128, 128>}, {pipeline_mode = #tpu.pipeline_mode<synchronous>, transform_indices = @transform_7, window_bounds = array<i64: 1, 128>}, {pipeline_mode = #tpu.pipeline_mode<synchronous>, transform_indices = @transform_8, window_bounds = array<i64: 16, 128>}, {pipeline_mode = #tpu.pipeline_mode<synchronous>, transform_indices = @transform_9, window_bounds = array<i64: 1, 128>}, {pipeline_mode = #tpu.pipeline_mode<synchronous>, transform_indices = @transform_10, window_bounds = array<i64: 128, 256>}, {pipeline_mode = #tpu.pipeline_mode<synchronous>, transform_indices = @transform_11, window_bounds = array<i64: 1, 256>}, {pipeline_mode = #tpu.pipeline_mode<synchronous>, transform_indices = @transform_12, window_bounds = array<i64: 256, 128>}, {pipeline_mode = #tpu.pipeline_mode<synchronous>, transform_indices = @transform_13, window_bounds = array<i64: 1, 128>}, {transform_indices = @transform_14, window_bounds = array<i64: 128, 128>}, {transform_indices = @transform_15, window_bounds = array<i64: 128, 128>}]} {
    %c0 = arith.constant 0 : index
    %c0_0 = arith.constant 0 : index
    %0 = vector.load %arg1[%c0, %c0_0] : memref<128x64xf32, #tpu.memory_space<vmem>>, vector<128x64xf32>
    %1 = arith.truncf %0 : vector<128x64xf32> to vector<128x64xbf16>
    %c0_1 = arith.constant 0 : index
    %c0_2 = arith.constant 0 : index
    %2 = vector.load %arg3[%c0_1, %c0_2] : memref<64x256xbf16, #tpu.memory_space<vmem>>, vector<64x256xbf16>
    %cst = arith.constant dense<0.000000e+00> : vector<128x256xf32>
    %3 = tpu.matmul %1, %2, %cst {dimension_numbers = #tpu.dot_dimension_numbers<[1], [0], [0], [1], [0, 0, 1, 1], [], []>} : vector<128x64xbf16>, vector<64x256xbf16>, vector<128x256xf32> -> vector<128x256xf32>
    %c0_3 = arith.constant 0 : index
    %c0_4 = arith.constant 0 : index
    %4 = vector.load %arg4[%c0_3, %c0_4] : memref<1x256xf32, #tpu.memory_space<vmem>>, vector<1x256xf32>
    %5 = vector.broadcast %4 : vector<1x256xf32> to vector<128x256xf32>
    %6 = arith.addf %3, %5 : vector<128x256xf32>
    %cst_5 = arith.constant 0.000000e+00 : f32
    %7 = vector.broadcast %cst_5 : f32 to vector<128x256xf32>
    %8 = arith.maximumf %6, %7 : vector<128x256xf32>
    %9 = arith.truncf %8 : vector<128x256xf32> to vector<128x256xbf16>
    %c0_6 = arith.constant 0 : index
    %c0_7 = arith.constant 0 : index
    %10 = vector.load %arg5[%c0_6, %c0_7] : memref<256x128xbf16, #tpu.memory_space<vmem>>, vector<256x128xbf16>
    %cst_8 = arith.constant dense<0.000000e+00> : vector<128x128xf32>
    %11 = tpu.matmul %9, %10, %cst_8 {dimension_numbers = #tpu.dot_dimension_numbers<[1], [0], [0], [1], [0, 0, 1, 1], [], []>} : vector<128x256xbf16>, vector<256x128xbf16>, vector<128x128xf32> -> vector<128x128xf32>
    %c0_9 = arith.constant 0 : index
    %c0_10 = arith.constant 0 : index
    %12 = vector.load %arg6[%c0_9, %c0_10] : memref<1x128xf32, #tpu.memory_space<vmem>>, vector<1x128xf32>
    %13 = vector.broadcast %12 : vector<1x128xf32> to vector<128x128xf32>
    %14 = arith.addf %11, %13 : vector<128x128xf32>
    %cst_11 = arith.constant 0.000000e+00 : f32
    %15 = vector.broadcast %cst_11 : f32 to vector<128x128xf32>
    %16 = arith.maximumf %14, %15 : vector<128x128xf32>
    %17 = arith.truncf %16 : vector<128x128xf32> to vector<128x128xbf16>
    %c0_12 = arith.constant 0 : index
    %c0_13 = arith.constant 0 : index
    %18 = vector.load %arg7[%c0_12, %c0_13] : memref<128x128xbf16, #tpu.memory_space<vmem>>, vector<128x128xbf16>
    %cst_14 = arith.constant dense<0.000000e+00> : vector<128x128xf32>
    %19 = tpu.matmul %17, %18, %cst_14 {dimension_numbers = #tpu.dot_dimension_numbers<[1], [0], [0], [1], [0, 0, 1, 1], [], []>} : vector<128x128xbf16>, vector<128x128xbf16>, vector<128x128xf32> -> vector<128x128xf32>
    %c0_15 = arith.constant 0 : index
    %c0_16 = arith.constant 0 : index
    %20 = vector.load %arg8[%c0_15, %c0_16] : memref<1x128xf32, #tpu.memory_space<vmem>>, vector<1x128xf32>
    %21 = vector.broadcast %20 : vector<1x128xf32> to vector<128x128xf32>
    %22 = arith.addf %19, %21 : vector<128x128xf32>
    %23 = vector.extract_strided_slice %22 {offsets = [0, 0], sizes = [128, 16], strides = [1, 1]} : vector<128x128xf32> to vector<128x16xf32>
    %24 = vector.extract_strided_slice %22 {offsets = [0, 16], sizes = [128, 16], strides = [1, 1]} : vector<128x128xf32> to vector<128x16xf32>
    %c0_17 = arith.constant 0 : index
    %c0_18 = arith.constant 0 : index
    %25 = vector.load %arg2[%c0_17, %c0_18] : memref<128x16xf32, #tpu.memory_space<vmem>>, vector<128x16xf32>
    %cst_19 = arith.constant 5.000000e-01 : f32
    %26 = vector.broadcast %cst_19 : f32 to vector<128x16xf32>
    %27 = arith.mulf %26, %24 : vector<128x16xf32>
    %28 = math.exp %27 : vector<128x16xf32>
    %29 = arith.mulf %25, %28 : vector<128x16xf32>
    %30 = arith.addf %23, %29 : vector<128x16xf32>
    %31 = arith.truncf %30 : vector<128x16xf32> to vector<128x16xbf16>
    %c0_20 = arith.constant 0 : index
    %c0_21 = arith.constant 0 : index
    %32 = vector.load %arg9[%c0_20, %c0_21] : memref<16x128xbf16, #tpu.memory_space<vmem>>, vector<16x128xbf16>
    %cst_22 = arith.constant dense<0.000000e+00> : vector<128x128xf32>
    %33 = tpu.matmul %31, %32, %cst_22 {dimension_numbers = #tpu.dot_dimension_numbers<[1], [0], [0], [1], [0, 0, 1, 1], [], []>} : vector<128x16xbf16>, vector<16x128xbf16>, vector<128x128xf32> -> vector<128x128xf32>
    %c0_23 = arith.constant 0 : index
    %c0_24 = arith.constant 0 : index
    %34 = vector.load %arg10[%c0_23, %c0_24] : memref<1x128xf32, #tpu.memory_space<vmem>>, vector<1x128xf32>
    %35 = vector.broadcast %34 : vector<1x128xf32> to vector<128x128xf32>
    %36 = arith.addf %33, %35 : vector<128x128xf32>
    %cst_25 = arith.constant 0.000000e+00 : f32
    %37 = vector.broadcast %cst_25 : f32 to vector<128x128xf32>
    %38 = arith.maximumf %36, %37 : vector<128x128xf32>
    %39 = arith.truncf %38 : vector<128x128xf32> to vector<128x128xbf16>
    %c0_26 = arith.constant 0 : index
    %c0_27 = arith.constant 0 : index
    %40 = vector.load %arg11[%c0_26, %c0_27] : memref<128x256xbf16, #tpu.memory_space<vmem>>, vector<128x256xbf16>
    %cst_28 = arith.constant dense<0.000000e+00> : vector<128x256xf32>
    %41 = tpu.matmul %39, %40, %cst_28 {dimension_numbers = #tpu.dot_dimension_numbers<[1], [0], [0], [1], [0, 0, 1, 1], [], []>} : vector<128x128xbf16>, vector<128x256xbf16>, vector<128x256xf32> -> vector<128x256xf32>
    %c0_29 = arith.constant 0 : index
    %c0_30 = arith.constant 0 : index
    %42 = vector.load %arg12[%c0_29, %c0_30] : memref<1x256xf32, #tpu.memory_space<vmem>>, vector<1x256xf32>
    %43 = vector.broadcast %42 : vector<1x256xf32> to vector<128x256xf32>
    %44 = arith.addf %41, %43 : vector<128x256xf32>
    %cst_31 = arith.constant 0.000000e+00 : f32
    %45 = vector.broadcast %cst_31 : f32 to vector<128x256xf32>
    %46 = arith.maximumf %44, %45 : vector<128x256xf32>
    %47 = arith.truncf %46 : vector<128x256xf32> to vector<128x256xbf16>
    %c0_32 = arith.constant 0 : index
    %c0_33 = arith.constant 0 : index
    %48 = vector.load %arg13[%c0_32, %c0_33] : memref<256x128xbf16, #tpu.memory_space<vmem>>, vector<256x128xbf16>
    %cst_34 = arith.constant dense<0.000000e+00> : vector<128x128xf32>
    %49 = tpu.matmul %47, %48, %cst_34 {dimension_numbers = #tpu.dot_dimension_numbers<[1], [0], [0], [1], [0, 0, 1, 1], [], []>} : vector<128x256xbf16>, vector<256x128xbf16>, vector<128x128xf32> -> vector<128x128xf32>
    %c0_35 = arith.constant 0 : index
    %c0_36 = arith.constant 0 : index
    %50 = vector.load %arg14[%c0_35, %c0_36] : memref<1x128xf32, #tpu.memory_space<vmem>>, vector<1x128xf32>
    %51 = vector.broadcast %50 : vector<1x128xf32> to vector<128x128xf32>
    %52 = arith.addf %49, %51 : vector<128x128xf32>
    %53 = arith.negf %52 : vector<128x128xf32>
    %54 = math.exp %53 : vector<128x128xf32>
    %cst_37 = arith.constant 1.000000e+00 : f32
    %55 = vector.broadcast %cst_37 : f32 to vector<128x128xf32>
    %56 = arith.addf %55, %54 : vector<128x128xf32>
    %57 = arith.divf %55, %56 : vector<128x128xf32>
    %c0_38 = arith.constant 0 : index
    %c0_39 = arith.constant 0 : index
    %58 = vector.load %arg15[%c0_38, %c0_39] : memref<128x128xf32, #tpu.memory_space<vmem>>, vector<128x128xf32>
    tpu.vector_store %arg15[%c0_38, %c0_39], %57 {strides = array<i32>} : memref<128x128xf32, #tpu.memory_space<vmem>>, vector<128x128xf32>,
    %c0_40 = arith.constant 0 : index
    %c0_41 = arith.constant 0 : index
    %59 = vector.load %arg16[%c0_40, %c0_41] : memref<128x128xf32, #tpu.memory_space<vmem>>, vector<128x128xf32>
    tpu.vector_store %arg16[%c0_40, %c0_41], %22 {strides = array<i32>} : memref<128x128xf32, #tpu.memory_space<vmem>>, vector<128x128xf32>,
    return
  }
  func.func @transform_0(%arg0: i32) -> (i32, i32) {
    %c0_i32 = arith.constant 0 : i32
    %c0_i32_0 = arith.constant 0 : i32
    return %arg0, %c0_i32 : i32, i32
  }
  func.func @transform_1(%arg0: i32) -> (i32, i32) {
    %c0_i32 = arith.constant 0 : i32
    %c0_i32_0 = arith.constant 0 : i32
    return %arg0, %c0_i32 : i32, i32
  }
  func.func @transform_2(%arg0: i32) -> (i32, i32) {
    %c0_i32 = arith.constant 0 : i32
    %c0_i32_0 = arith.constant 0 : i32
    %c0_i32_1 = arith.constant 0 : i32
    return %c0_i32, %c0_i32_0 : i32, i32
  }
  func.func @transform_3(%arg0: i32) -> (i32, i32) {
    %c0_i32 = arith.constant 0 : i32
    %c0_i32_0 = arith.constant 0 : i32
    %c0_i32_1 = arith.constant 0 : i32
    return %c0_i32, %c0_i32_0 : i32, i32
  }
  func.func @transform_4(%arg0: i32) -> (i32, i32) {
    %c0_i32 = arith.constant 0 : i32
    %c0_i32_0 = arith.constant 0 : i32
    %c0_i32_1 = arith.constant 0 : i32
    return %c0_i32, %c0_i32_0 : i32, i32
  }
  func.func @transform_5(%arg0: i32) -> (i32, i32) {
    %c0_i32 = arith.constant 0 : i32
    %c0_i32_0 = arith.constant 0 : i32
    %c0_i32_1 = arith.constant 0 : i32
    return %c0_i32, %c0_i32_0 : i32, i32
  }
  func.func @transform_6(%arg0: i32) -> (i32, i32) {
    %c0_i32 = arith.constant 0 : i32
    %c0_i32_0 = arith.constant 0 : i32
    %c0_i32_1 = arith.constant 0 : i32
    return %c0_i32, %c0_i32_0 : i32, i32
  }
  func.func @transform_7(%arg0: i32) -> (i32, i32) {
    %c0_i32 = arith.constant 0 : i32
    %c0_i32_0 = arith.constant 0 : i32
    %c0_i32_1 = arith.constant 0 : i32
    return %c0_i32, %c0_i32_0 : i32, i32
  }
  func.func @transform_8(%arg0: i32) -> (i32, i32) {
    %c0_i32 = arith.constant 0 : i32
    %c0_i32_0 = arith.constant 0 : i32
    %c0_i32_1 = arith.constant 0 : i32
    return %c0_i32, %c0_i32_0 : i32, i32
  }
  func.func @transform_9(%arg0: i32) -> (i32, i32) {
    %c0_i32 = arith.constant 0 : i32
    %c0_i32_0 = arith.constant 0 : i32
    %c0_i32_1 = arith.constant 0 : i32
    return %c0_i32, %c0_i32_0 : i32, i32
  }
  func.func @transform_10(%arg0: i32) -> (i32, i32) {
    %c0_i32 = arith.constant 0 : i32
    %c0_i32_0 = arith.constant 0 : i32
    %c0_i32_1 = arith.constant 0 : i32
    return %c0_i32, %c0_i32_0 : i32, i32
  }
  func.func @transform_11(%arg0: i32) -> (i32, i32) {
    %c0_i32 = arith.constant 0 : i32
    %c0_i32_0 = arith.constant 0 : i32
    %c0_i32_1 = arith.constant 0 : i32
    return %c0_i32, %c0_i32_0 : i32, i32
  }
  func.func @transform_12(%arg0: i32) -> (i32, i32) {
    %c0_i32 = arith.constant 0 : i32
    %c0_i32_0 = arith.constant 0 : i32
    %c0_i32_1 = arith.constant 0 : i32
    return %c0_i32, %c0_i32_0 : i32, i32
  }
  func.func @transform_13(%arg0: i32) -> (i32, i32) {
    %c0_i32 = arith.constant 0 : i32
    %c0_i32_0 = arith.constant 0 : i32
    %c0_i32_1 = arith.constant 0 : i32
    return %c0_i32, %c0_i32_0 : i32, i32
  }
  func.func @transform_14(%arg0: i32) -> (i32, i32) {
    %c0_i32 = arith.constant 0 : i32
    %c0_i32_0 = arith.constant 0 : i32
    return %arg0, %c0_i32 : i32, i32
  }
  func.func @transform_15(%arg0: i32) -> (i32, i32) {
    %c0_i32 = arith.constant 0 : i32
    %c0_i32_0 = arith.constant 0 : i32
    return %arg0, %c0_i32 : i32, i32
  }
}

</mosaic_0001>

<bundles_post_ra>
// kernel: vae_forward.1
= control target key start
LH: loop header
LB: loop body
LE: loop exit
PB: predicated region body
PF: predicated region fallthrough
CT: control target
= control target key end

     0   :  { %s2943_s18 = smov 0   ;;  %s3593_s0 = inlined_call_operand.vmem [shape: f32[256,64], index: 0, kind: input, shape index: {}]   ;;  %s3594_s1 = inlined_call_operand.vmem [shape: f32[256,16], index: 1, kind: input, shape index: {}]   ;;  %s3595_s2 = inlined_call_operand.vmem [shape: bf16[64,256], index: 2, kind: input, shape index: {}]   ;;  %s3596_s3 = inlined_call_operand.vmem [shape: f32[1,256], index: 3, kind: input, shape index: {}]   ;;  %s3597_s4 = inlined_call_operand.vmem [shape: bf16[256,128], index: 4, kind: input, shape index: {}]   ;;  %s3598_s5 = inlined_call_operand.vmem [shape: f32[1,128], index: 5, kind: input, shape index: {}]   ;;  %s3599_s6 = inlined_call_operand.vmem [shape: bf16[128,128], index: 6, kind: input, shape index: {}]   ;;  %s3600_s7 = inlined_call_operand.vmem [shape: f32[1,128], index: 7, kind: input, shape index: {}]   ;;  %s3601_s8 = inlined_call_operand.vmem [shape: bf16[16,128], index: 8, kind: input, shape index: {}]   ;;  %s3602_s9 = inlined_call_operand.vmem [shape: f32[1,128], index: 9, kind: input, shape index: {}]   ;;  %s3603_s10 = inlined_call_operand.vmem [shape: bf16[128,256], index: 10, kind: input, shape index: {}]   ;;  %s3604_s11 = inlined_call_operand.vmem [shape: f32[1,256], index: 11, kind: input, shape index: {}]   ;;  %s3605_s12 = inlined_call_operand.vmem [shape: bf16[256,128], index: 12, kind: input, shape index: {}]   ;;  %s3606_s13 = inlined_call_operand.vmem [shape: f32[1,128], index: 13, kind: input, shape index: {}]   ;;  %s3607_s14 = inlined_call_operand.vmem [shape: f32[256,128], index: 14, kind: output, shape index: {0}]   ;;  %s3608_s15 = inlined_call_operand.vmem [shape: f32[256,128], index: 15, kind: output, shape index: {1}]  }
   0x1 LB: > { %s2349_s19 = sadd.s32 4294967295, %s2860_s18   ;;  %p2353_p0 = scmp.ge.s32.totalorder %s2860_s18, 1  ;;  %s2860_s18 = sphi %s2943_s18, %s26_s18  }
   0x2   : > { %p452_p1 = scmp.lt.s32.totalorder %s2860_s18, 3 }
   0x4   : > { %p453_p2 = pnand %p2353_p0, %p452_p1 }
   0x5   : > { %s2354_s16 = sshll.u32 (!%p453_p2), %s2349_s19, 4  ;;  %s2862_s23 = smov (!%p453_p2), 112  }
   0x6   : > { %456 = sbr.rel (%p453_p2) target bundleno = 1156 (0x484), region = 76  ;;  %p511_p3 = scmp.lt.s32.totalorder (!%p453_p2), %s2354_s16, 31 }
   0xb   : > { %v2388_v0 = vld [vmem:[%s3595_s2 + $0x30] sm:$0xf]  ;;  %v2671_v1 = vld [vmem:[%s3595_s2 + $0x34] sm:$0xf0]  ;;  %v2670_v2 = vld [vmem:[%s3595_s2 + $0x34] sm:$0xf] }
   0xc   : > { %v2389_v3 = vor.u32 %v2671_v1, %v2388_v0  ;;  %v2390_v4 = vld [vmem:[%s3595_s2 + $0x38] sm:$0xf0]  ;;  %v2380_v5 = vld [vmem:[%s3595_s2 + $0x20] sm:$0xf]  ;;  %v2669_v6 = vld [vmem:[%s3595_s2 + $0x24] sm:$0xf0] }
   0xd   : > { %v2393_v7 = vor.u32 %v2670_v2, %v2390_v4  ;;  %v2668_v8 = vld [vmem:[%s3595_s2 + $0x24] sm:$0xf]  ;;  %v2382_v9 = vld [vmem:[%s3595_s2 + $0x28] sm:$0xf0]  ;;  %v2381_v10 = vor.u32 %v2669_v6, %v2380_v5  ;;  %v2372_v12 = vld [vmem:[%s3595_s2 + $0x10] sm:$0xf] }
   0xe   : > { %642 = vmatpush.bf16.msra.mxu0 %v2389_v3  ;;  %2729 = vmatpush.bf16.msra.mxu2 %v2389_v3  ;;  %v2385_v11 = vor.u32 %v2668_v8, %v2382_v9  ;;  %v2667_v13 = vld [vmem:[%s3595_s2 + $0x14] sm:$0xf0]  ;;  %v2666_v14 = vld [vmem:[%s3595_s2 + $0x14] sm:$0xf]  ;;  %v2374_v15 = vld [vmem:[%s3595_s2 + $0x18] sm:$0xf0] }
   0xf   : > { %691 = vmatpush.bf16.msra.mxu1 %v2393_v7  ;;  %2733 = vmatpush.bf16.msra.mxu3 %v2393_v7  ;;  %v2373_v16 = vor.u32 %v2667_v13, %v2372_v12  ;;  %v2377_v17 = vor.u32 %v2666_v14, %v2374_v15  ;;  %v2364_v18 = vld [vmem:[%s3595_s2] sm:$0xf]  ;;  %v2665_v19 = vld [vmem:[%s3595_s2 + $0x4] sm:$0xf0]  ;;  %s3610_s16 = smov (!%p511_p3, %s2354_s16), 31  ;;  %vm613_vm0 = vcmask 523264  }
  0x10   : > { %v2664_v20 = vld [vmem:[%s3595_s2 + $0x4] sm:$0xf]  ;;  %v2366_v21 = vld [vmem:[%s3595_s2 + $0x8] sm:$0xf0]  ;;  %s2999_s26 = sshll.u32 %s3610_s16, 3  ;;  %v2365_v22 = vor.u32 %v2665_v19, %v2364_v18  ;;  %v2687_v38 = vld [vmem:[%s3597_s4 + $0x78] sm:$0xff] }
  0x11   : > { %s3005_s29 = scalar_lea.vmem %s3593_s0, %s2999_s26  ;;  %v2369_v23 = vor.u32 %v2664_v20, %v2366_v21  ;;  %v2686_v40 = vld [vmem:[%s3597_s4 + $0x70] sm:$0xff]  ;;  %v2679_v41 = vld [vmem:[%s3597_s4 + $0x38] sm:$0xff]  ;;  %v2685_v43 = vld [vmem:[%s3597_s4 + $0x68] sm:$0xff]  ;;  %s3312_s24 = scalar_lea.vmem %s3594_s1, %s2999_s26  ;;  %vm1335_vm1 = vcmask 130048  }
  0x12   : > { %643 = vmatpush.bf16.msra.mxu0 %v2381_v10  ;;  %2730 = vmatpush.bf16.msra.mxu2 %v2381_v10  ;;  %v535_v24 = vld [vmem:[%s3005_s29] sm:$0xff]  ;;  %v536_v25 = vld [vmem:[%s3005_s29 + $0x8] sm:$0xff]  ;;  %v537_v27 = vld [vmem:[%s3005_s29 + $0x10] sm:$0xff]  ;;  %s3560_s21 = scalar_lea.vmem %s3607_s14, %s2999_s26 }
  0x13   : > { %692 = vmatpush.bf16.msra.mxu1 %v2385_v11  ;;  %2734 = vmatpush.bf16.msra.mxu3 %v2385_v11  ;;  %v551_v26 = vpack.c.bf16 %v536_v25, %v535_v24  ;;  %v538_v28 = vld [vmem:[%s3005_s29 + $0x18] sm:$0xff]  ;;  %v543_v30 = vld [vmem:[%s3005_s29 + $0x40] sm:$0xff]  ;;  %v544_v31 = vld [vmem:[%s3005_s29 + $0x48] sm:$0xff] }
  0x14   : > { %v552_v29 = vpack.c.bf16 %v538_v28, %v537_v27  ;;  %v555_v32 = vpack.c.bf16 %v544_v31, %v543_v30  ;;  %v539_v33 = vld [vmem:[%s3005_s29 + $0x20] sm:$0xff]  ;;  %v540_v34 = vld [vmem:[%s3005_s29 + $0x28] sm:$0xff]  ;;  %v545_v36 = vld [vmem:[%s3005_s29 + $0x50] sm:$0xff] }
  0x15   : > { %v553_v35 = vpack.c.bf16 %v540_v34, %v539_v33  ;;  %v546_v37 = vld [vmem:[%s3005_s29 + $0x58] sm:$0xff]  ;;  %v2678_v42 = vld [vmem:[%s3597_s4 + $0x30] sm:$0xff]  ;;  %v2677_v44 = vld [vmem:[%s3597_s4 + $0x28] sm:$0xff] }
  0x16   : > { %644 = vmatpush.bf16.msra.mxu0 %v2373_v16  ;;  %2731 = vmatpush.bf16.msra.mxu2 %v2373_v16  ;;  %v556_v39 = vpack.c.bf16 %v546_v37, %v545_v36  ;;  %v541_v45 = vld [vmem:[%s3005_s29 + $0x30] sm:$0xff]  ;;  %v542_v46 = vld [vmem:[%s3005_s29 + $0x38] sm:$0xff]  ;;  %v2684_v47 = vld [vmem:[%s3597_s4 + $0x60] sm:$0xff] }
  0x17   : > { %693 = vmatpush.bf16.msra.mxu1 %v2377_v17  ;;  %2735 = vmatpush.bf16.msra.mxu3 %v2377_v17  ;;  %v554_v48 = vpack.c.bf16 %v542_v46, %v541_v45  ;;  %v547_v49 = vld [vmem:[%s3005_s29 + $0x60] sm:$0xff]  ;;  %v548_v50 = vld [vmem:[%s3005_s29 + $0x68] sm:$0xff]  ;;  %v2683_v52 = vld [vmem:[%s3597_s4 + $0x58] sm:$0xff] }
  0x18   : > { %v2676_v51 = vld [vmem:[%s3597_s4 + $0x20] sm:$0xff]  ;;  %v557_v53 = vpack.c.bf16 %v548_v50, %v547_v49  ;;  %v2675_v54 = vld [vmem:[%s3597_s4 + $0x18] sm:$0xff]  ;;  %v2682_v55 = vld [vmem:[%s3597_s4 + $0x50] sm:$0xff] }
  0x19   : > { %v2674_v56 = vld [vmem:[%s3597_s4 + $0x10] sm:$0xff]  ;;  %v550_v58 = vld [vmem:[%s3005_s29 + $0x78] sm:$0xff]  ;;  %v2681_v60 = vld [vmem:[%s3597_s4 + $0x48] sm:$0xff] }
  0x1a   : > { %645 = vmatpush.bf16.msra.mxu0 %v2365_v22  ;;  %2732 = vmatpush.bf16.msra.mxu2 %v2365_v22  ;;  %v549_v57 = vld [vmem:[%s3005_s29 + $0x70] sm:$0xff]  ;;  %v2673_v61 = vld [vmem:[%s3597_s4 + $0x8] sm:$0xff]  ;;  %v2672_v62 = vld [vmem:[%s3597_s4] sm:$0xff]  ;;  %s3180_s29 = scalar_lea.vmem %s3608_s15, %s2999_s26 }
  0x1b   : > { %694 = vmatpush.bf16.msra.mxu1 %v2369_v23  ;;  %2736 = vmatpush.bf16.msra.mxu3 %v2369_v23  ;;  %v558_v59 = vpack.c.bf16 %v550_v58, %v549_v57  ;;  %v2680_v63 = vld [vmem:[%s3597_s4 + $0x40] sm:$0xff]  ;;  %v2694_v49 = vld [vmem:[%s3599_s6 + $0x30] sm:$0xff] }
  0x1c   : > { %v567_v0 = vld [vmem:[%s3596_s3] sm:$0x3] }
  0x1d   : > { %2394 = vmatmul.msk.bf16.vlgmr.msra.gmra.mxu0 %vm613_vm0, %v551_v26  ;;  %2399 = vmatmul.msk.bf16.vlgmr.msra.gmra.mxu2 %vm613_vm0, %v556_v39  ;;  %v3090_v3 = vperm.slane %v567_v0, 0  ;;  %v3092_v4 = vperm.slane %v567_v0, 1 }
  0x1e   : > { %2402 = vmatmul.msk.bf16.vlgmr.msra.gmra.mxu1 %vm613_vm0, %v551_v26  ;;  %2406 = vmatmul.msk.bf16.vlgmr.msra.gmra.mxu3 %vm613_vm0, %v555_v32 }
  0x1f   : > { %965 = vmatpush.bf16.msrb.mxu3 %v2687_v38  ;;  %916 = vmatpush.bf16.msrb.mxu2 %v2679_v41 }
  0x23   : > { %966 = vmatpush.bf16.msrb.mxu3 %v2686_v40  ;;  %917 = vmatpush.bf16.msrb.mxu2 %v2678_v42 }
  0x27   : > { %967 = vmatpush.bf16.msrb.mxu3 %v2685_v43  ;;  %918 = vmatpush.bf16.msrb.mxu2 %v2677_v44 }
  0x2b   : > { %968 = vmatpush.bf16.msrb.mxu3 %v2684_v47  ;;  %919 = vmatpush.bf16.msrb.mxu2 %v2676_v51  ;;  %v2695_v47 = vld [vmem:[%s3599_s6 + $0x38] sm:$0xff] }
  0x2c   : > { %1106 = vmatpush.bf16.msrb.mxu0 %v2695_v47 }
  0x2d   : > { %2395 = vmatmul.msk.bf16.gmra.mxu0 %vm613_vm0, %v552_v29  ;;  %2400 = vmatmul.msk.bf16.gmra.mxu2 %vm613_vm0, %v557_v53 }
  0x2e   : > { %2403 = vmatmul.msk.bf16.gmra.mxu1 %vm613_vm0, %v552_v29  ;;  %2407 = vmatmul.msk.bf16.gmra.mxu3 %vm613_vm0, %v556_v39 }
  0x2f   : > { %969 = vmatpush.bf16.msrb.mxu3 %v2683_v52  ;;  %920 = vmatpush.bf16.msrb.mxu2 %v2675_v54 }
  0x30   : > { %1107 = vmatpush.bf16.msrb.mxu0 %v2694_v49 }
  0x33   : > { %970 = vmatpush.bf16.msrb.mxu3 %v2682_v55  ;;  %921 = vmatpush.bf16.msrb.mxu2 %v2674_v56 }
  0x37   : > { %971 = vmatpush.bf16.msrb.mxu3 %v2681_v60  ;;  %922 = vmatpush.bf16.msrb.mxu2 %v2673_v61 }
  0x3b   : > { %923 = vmatpush.bf16.msrb.mxu2 %v2672_v62  ;;  %972 = vmatpush.bf16.msrb.mxu3 %v2680_v63 }
  0x3d   : > { %2396 = vmatmul.msk.bf16.gmra.mxu0 %vm613_vm0, %v553_v35  ;;  %2401 = vmatmul.msk.bf16.gmra.mxu2 %vm613_vm0, %v558_v59 }
  0x3e   : > { %2404 = vmatmul.msk.bf16.gmra.mxu1 %vm613_vm0, %v553_v35  ;;  %2408 = vmatmul.msk.bf16.gmra.mxu3 %vm613_vm0, %v557_v53 }
  0x4d   : > { %2397 = vmatmul.msk.bf16.gmra.mxu0 %vm613_vm0, %v554_v48 }
  0x4e   : > { %2405 = vmatmul.msk.bf16.gmra.mxu1 %vm613_vm0, %v554_v48  ;;  %2409 = vmatmul.msk.bf16.gmra.mxu3 %vm613_vm0, %v558_v59 }
  0x5d   : > { %2398 = vmatmul.msk.bf16.gmra.mxu0 %vm613_vm0, %v555_v32 }
  0x9a   : > { %v647_v1 = vpop.f32.mrf.mxu0 }
  0x9b   : > { %v696_v2 = vpop.f32.mrf.mxu1  ;;  %v648_v5 = vadd.f32 %v647_v1, %v3090_v3  ;;  %v2693_v1 = vld [vmem:[%s3599_s6 + $0x28] sm:$0xff] }
  0x9c   : > { %v697_v6 = vadd.f32 %v696_v2, %v3092_v4  ;;  %1108 = vmatpush.bf16.msrb.mxu0 %v2693_v1 }
  0x9d   : > { %v736_v11 = vmax.f32 %v648_v5, 0.0 }
  0x9e   : > { %v737_v13 = vmax.f32 %v697_v6, 0.0 }
  0xa0   : > { %v672_v0 = vpop.f32.mrf.mxu2 }
  0xa1   : > { %v716_v44 = vpop.f32.mrf.mxu3 }
  0xa2   : > { %v649_v7 = vpop.f32.mrf.mxu0  ;;  %v717_v5 = vadd.f32 %v716_v44, %v3092_v4 }
  0xa3   : > { %v650_v8 = vadd.f32 %v649_v7, %v3090_v3  ;;  %v698_v9 = vpop.f32.mrf.mxu1 }
  0xa4   : > { %v699_v10 = vadd.f32 %v698_v9, %v3092_v4 }
  0xa5   : > { %v738_v12 = vmax.f32 %v650_v8, 0.0 }
  0xa6   : > { %v739_v14 = vmax.f32 %v699_v10, 0.0  ;;  %v753_v10 = vmax.f32 %v717_v5, 0.0 }
  0xa7   : > { %v768_v15 = vpack.c.bf16 %v738_v12, %v736_v11 }
  0xa8   : > { %v769_v16 = vpack.c.bf16 %v739_v14, %v737_v13  ;;  %v674_v12 = vpop.f32.mrf.mxu2 }
  0xa9   : > { %924 = vmatmul.bf16.vlgmr.msrb.gmra.mxu2 %v768_v15  ;;  %v718_v51 = vpop.f32.mrf.mxu3 }
  0xaa   : > { %973 = vmatmul.bf16.vlgmr.msrb.gmra.mxu3 %v769_v16  ;;  %v652_v17 = vpop.f32.mrf.mxu0  ;;  %v719_v6 = vadd.f32 %v718_v51, %v3092_v4 }
  0xab   : > { %v701_v18 = vpop.f32.mrf.mxu1  ;;  %v653_v19 = vadd.f32 %v652_v17, %v3090_v3 }
  0xac   : > { %v702_v20 = vadd.f32 %v701_v18, %v3092_v4  ;;  %v755_v11 = vmax.f32 %v719_v6, 0.0  ;;  %v2692_v18 = vld [vmem:[%s3599_s6 + $0x20] sm:$0xff] }
  0xad   : > { %v740_v25 = vmax.f32 %v653_v19, 0.0  ;;  %1109 = vmatpush.bf16.msrb.mxu0 %v2692_v18  ;;  %v2691_v19 = vld [vmem:[%s3599_s6 + $0x18] sm:$0xff] }
  0xae   : > { %v741_v27 = vmax.f32 %v702_v20, 0.0  ;;  %v777_v17 = vpack.c.bf16 %v755_v11, %v753_v10 }
  0xb0   : > { %v677_v20 = vpop.f32.mrf.mxu2 }
  0xb1   : > { %v721_v2 = vpop.f32.mrf.mxu3  ;;  %1110 = vmatpush.bf16.msrb.mxu0 %v2691_v19 }
  0xb2   : > { %v654_v21 = vpop.f32.mrf.mxu0 }
  0xb3   : > { %v655_v22 = vadd.f32 %v654_v21, %v3090_v3  ;;  %v703_v23 = vpop.f32.mrf.mxu1  ;;  %v673_v21 = vadd.f32 %v672_v0, %v3090_v3 }
  0xb4   : > { %v704_v24 = vadd.f32 %v703_v23, %v3092_v4 }
  0xb5   : > { %v742_v26 = vmax.f32 %v655_v22, 0.0  ;;  %v675_v22 = vadd.f32 %v674_v12, %v3090_v3 }
  0xb6   : > { %v743_v28 = vmax.f32 %v704_v24, 0.0  ;;  %v722_v24 = vadd.f32 %v721_v2, %v3092_v4 }
  0xb7   : > { %v770_v29 = vpack.c.bf16 %v742_v26, %v740_v25  ;;  %v756_v26 = vmax.f32 %v673_v21, 0.0 }
  0xb8   : > { %v771_v30 = vpack.c.bf16 %v743_v28, %v741_v27  ;;  %v758_v27 = vmax.f32 %v675_v22, 0.0  ;;  %v757_v28 = vmax.f32 %v722_v24, 0.0 }
  0xb9   : > { %929 = vmatmul.bf16.gmra.mxu2 %v770_v29  ;;  %v723_v15 = vpop.f32.mrf.mxu3 }
  0xba   : > { %978 = vmatmul.bf16.gmra.mxu3 %v771_v30  ;;  %v657_v31 = vpop.f32.mrf.mxu0  ;;  %v724_v25 = vadd.f32 %v723_v15, %v3092_v4  ;;  %v778_v30 = vpack.c.bf16 %v758_v27, %v756_v26 }
  0xbb   : > { %v706_v32 = vpop.f32.mrf.mxu1  ;;  %v658_v33 = vadd.f32 %v657_v31, %v3090_v3 }
  0xbc   : > { %v707_v34 = vadd.f32 %v706_v32, %v3092_v4  ;;  %v759_v29 = vmax.f32 %v724_v25, 0.0  ;;  %v679_v32 = vpop.f32.mrf.mxu2 }
  0xbd   : > { %v744_v39 = vmax.f32 %v658_v33, 0.0 }
  0xbe   : > { %v745_v41 = vmax.f32 %v707_v34, 0.0  ;;  %v779_v31 = vpack.c.bf16 %v759_v29, %v757_v28  ;;  %v2690_v34 = vld [vmem:[%s3599_s6 + $0x10] sm:$0xff] }
  0xbf   : > { %1111 = vmatpush.bf16.msrb.mxu0 %v2690_v34 }
  0xc1   : > { %v726_v23 = vpop.f32.mrf.mxu3 }
  0xc2   : > { %v659_v35 = vpop.f32.mrf.mxu0 }
  0xc3   : > { %v660_v36 = vadd.f32 %v659_v35, %v3090_v3  ;;  %v708_v37 = vpop.f32.mrf.mxu1  ;;  %v2689_v35 = vld [vmem:[%s3599_s6 + $0x8] sm:$0xff] }
  0xc4   : > { %v709_v38 = vadd.f32 %v708_v37, %v3092_v4  ;;  %v680_v37 = vadd.f32 %v679_v32, %v3090_v3  ;;  %1112 = vmatpush.bf16.msrb.mxu0 %v2689_v35 }
  0xc5   : > { %v746_v40 = vmax.f32 %v660_v36, 0.0  ;;  %v678_v36 = vadd.f32 %v677_v20, %v3090_v3 }
  0xc6   : > { %v747_v42 = vmax.f32 %v709_v38, 0.0  ;;  %v727_v38 = vadd.f32 %v726_v23, %v3092_v4 }
  0xc7   : > { %v772_v43 = vpack.c.bf16 %v746_v40, %v744_v39  ;;  %v682_v40 = vpop.f32.mrf.mxu2 }
  0xc8   : > { %v773_v45 = vpack.c.bf16 %v747_v42, %v745_v41  ;;  %v760_v41 = vmax.f32 %v678_v36, 0.0  ;;  %v762_v42 = vmax.f32 %v680_v37, 0.0  ;;  %v761_v44 = vmax.f32 %v727_v38, 0.0 }
  0xc9   : > { %934 = vmatmul.bf16.gmra.mxu2 %v772_v43  ;;  %v728_v33 = vpop.f32.mrf.mxu3 }
  0xca   : > { %983 = vmatmul.bf16.gmra.mxu3 %v773_v45  ;;  %v662_v46 = vpop.f32.mrf.mxu0  ;;  %v729_v39 = vadd.f32 %v728_v33, %v3092_v4 }
  0xcb   : > { %v711_v48 = vpop.f32.mrf.mxu1  ;;  %v663_v50 = vadd.f32 %v662_v46, %v3090_v3  ;;  %v780_v46 = vpack.c.bf16 %v762_v42, %v760_v41 }
  0xcc   : > { %v712_v52 = vadd.f32 %v711_v48, %v3092_v4  ;;  %v763_v45 = vmax.f32 %v729_v39, 0.0 }
  0xcd   : > { %v748_v57 = vmax.f32 %v663_v50, 0.0  ;;  %v683_v50 = vadd.f32 %v682_v40, %v3090_v3 }
  0xce   : > { %v749_v59 = vmax.f32 %v712_v52, 0.0  ;;  %v781_v47 = vpack.c.bf16 %v763_v45, %v761_v44 }
  0xcf   : > { %v684_v48 = vpop.f32.mrf.mxu2 }
  0xd0   : > { %v685_v51 = vadd.f32 %v684_v48, %v3090_v3 }
  0xd1   : > { %v731_v43 = vpop.f32.mrf.mxu3 }
  0xd2   : > { %v664_v53 = vpop.f32.mrf.mxu0  ;;  %v732_v52 = vadd.f32 %v731_v43, %v3092_v4 }
  0xd3   : > { %v665_v54 = vadd.f32 %v664_v53, %v3090_v3  ;;  %v713_v55 = vpop.f32.mrf.mxu1 }
  0xd4   : > { %v714_v56 = vadd.f32 %v713_v55, %v3092_v4  ;;  %v764_v55 = vmax.f32 %v683_v50, 0.0 }
  0xd5   : > { %v750_v58 = vmax.f32 %v665_v54, 0.0  ;;  %v2688_v54 = vld [vmem:[%s3599_s6] sm:$0xff] }
  0xd6   : > { %v751_v60 = vmax.f32 %v714_v56, 0.0  ;;  %v766_v56 = vmax.f32 %v685_v51, 0.0  ;;  %1113 = vmatpush.bf16.msrb.mxu0 %v2688_v54 }
  0xd7   : > { %v774_v61 = vpack.c.bf16 %v750_v58, %v748_v57  ;;  %v765_v57 = vmax.f32 %v732_v52, 0.0 }
  0xd8   : > { %v775_v62 = vpack.c.bf16 %v751_v60, %v749_v59  ;;  %v782_v59 = vpack.c.bf16 %v766_v56, %v764_v55 }
  0xd9   : > { %939 = vmatmul.bf16.gmra.mxu2 %v774_v61  ;;  %v733_v49 = vpop.f32.mrf.mxu3 }
  0xda   : > { %988 = vmatmul.bf16.gmra.mxu3 %v775_v62  ;;  %v667_v63 = vpop.f32.mrf.mxu0  ;;  %v734_v53 = vadd.f32 %v733_v49, %v3092_v4 }
  0xdb   : > { %v668_v7 = vadd.f32 %v667_v63, %v3090_v3 }
  0xdc   : > { %v767_v58 = vmax.f32 %v734_v53, 0.0 }
  0xdd   : > { %v752_v13 = vmax.f32 %v668_v7, 0.0 }
  0xde   : > { %v783_v60 = vpack.c.bf16 %v767_v58, %v765_v57 }
  0xe2   : > { %v669_v8 = vpop.f32.mrf.mxu0 }
  0xe3   : > { %v670_v9 = vadd.f32 %v669_v8, %v3090_v3  ;;  %v3153_v3 = vld [vmem:[%s3598_s5] ss:$0 sm:$0xff] }
  0xe5   : > { %v754_v14 = vmax.f32 %v670_v9, 0.0 }
  0xe7   : > { %v776_v16 = vpack.c.bf16 %v754_v14, %v752_v13 }
  0xe9   : > { %944 = vmatmul.bf16.gmra.mxu2 %v776_v16 }
  0xea   : > { %993 = vmatmul.bf16.gmra.mxu3 %v777_v17 }
  0xf9   : > { %949 = vmatmul.bf16.gmra.mxu2 %v778_v30 }
  0xfa   : > { %998 = vmatmul.bf16.gmra.mxu3 %v779_v31 }
 0x109   : > { %954 = vmatmul.bf16.gmra.mxu2 %v780_v46 }
 0x10a   : > { %1003 = vmatmul.bf16.gmra.mxu3 %v781_v47 }
 0x119   : > { %959 = vmatmul.bf16.gmra.mxu2 %v782_v59 }
 0x11a   : > { %1008 = vmatmul.bf16.gmra.mxu3 %v783_v60 }
 0x12c   : > { %v925_v61 = vpop.f32.mrf.mxu2 }
 0x12d   : > { %v974_v4 = vpop.f32.mrf.mxu3  ;;  %v926_v62 = vadd.f32 %v3153_v3, %v925_v61 }
 0x12f   : > { %v975_v0 = vadd.f32 %v974_v4, %v926_v62 }
 0x131   : > { %v1014_v6 = vmax.f32 %v975_v0, 0.0 }
 0x134   : > { %v927_v63 = vpop.f32.mrf.mxu2 }
 0x135   : > { %v928_v1 = vadd.f32 %v3153_v3, %v927_v63  ;;  %v976_v2 = vpop.f32.mrf.mxu3 }
 0x137   : > { %v977_v5 = vadd.f32 %v976_v2, %v928_v1 }
 0x139   : > { %v1015_v7 = vmax.f32 %v977_v5, 0.0 }
 0x13b   : > { %v1030_v8 = vpack.c.bf16 %v1015_v7, %v1014_v6 }
 0x13c   : > { %v930_v9 = vpop.f32.mrf.mxu2 }
 0x13d   : > { %v979_v10 = vpop.f32.mrf.mxu3  ;;  %1114 = vmatmul.bf16.vlgmr.msrb.gmra.mxu0 %v1030_v8  ;;  %v931_v11 = vadd.f32 %v3153_v3, %v930_v9 }
 0x13f   : > { %v980_v13 = vadd.f32 %v979_v10, %v931_v11 }
 0x141   : > { %v1016_v17 = vmax.f32 %v980_v13, 0.0 }
 0x144   : > { %v932_v12 = vpop.f32.mrf.mxu2 }
 0x145   : > { %v933_v14 = vadd.f32 %v3153_v3, %v932_v12  ;;  %v981_v15 = vpop.f32.mrf.mxu3 }
 0x147   : > { %v982_v16 = vadd.f32 %v981_v15, %v933_v14 }
 0x149   : > { %v1017_v18 = vmax.f32 %v982_v16, 0.0 }
 0x14b   : > { %v1031_v19 = vpack.c.bf16 %v1017_v18, %v1016_v17 }
 0x14c   : > { %v935_v20 = vpop.f32.mrf.mxu2 }
 0x14d   : > { %v984_v21 = vpop.f32.mrf.mxu3  ;;  %1119 = vmatmul.bf16.gmra.mxu0 %v1031_v19  ;;  %v936_v22 = vadd.f32 %v3153_v3, %v935_v20 }
 0x14f   : > { %v985_v24 = vadd.f32 %v984_v21, %v936_v22 }
 0x151   : > { %v1018_v28 = vmax.f32 %v985_v24, 0.0 }
 0x154   : > { %v937_v23 = vpop.f32.mrf.mxu2 }
 0x155   : > { %v938_v25 = vadd.f32 %v3153_v3, %v937_v23  ;;  %v986_v26 = vpop.f32.mrf.mxu3  ;;  %v3174_v23 = vld [vmem:[%s3600_s7] ss:$0 sm:$0xff] }
 0x157   : > { %v987_v27 = vadd.f32 %v986_v26, %v938_v25 }
 0x159   : > { %v1019_v29 = vmax.f32 %v987_v27, 0.0 }
 0x15b   : > { %v1032_v30 = vpack.c.bf16 %v1019_v29, %v1018_v28 }
 0x15c   : > { %v940_v31 = vpop.f32.mrf.mxu2 }
 0x15d   : > { %v989_v32 = vpop.f32.mrf.mxu3  ;;  %1124 = vmatmul.bf16.gmra.mxu0 %v1032_v30  ;;  %v941_v33 = vadd.f32 %v3153_v3, %v940_v31 }
 0x15f   : > { %v990_v35 = vadd.f32 %v989_v32, %v941_v33 }
 0x161   : > { %v1020_v39 = vmax.f32 %v990_v35, 0.0 }
 0x164   : > { %v942_v34 = vpop.f32.mrf.mxu2 }
 0x165   : > { %v943_v36 = vadd.f32 %v3153_v3, %v942_v34  ;;  %v991_v37 = vpop.f32.mrf.mxu3 }
 0x167   : > { %v992_v38 = vadd.f32 %v991_v37, %v943_v36 }
 0x169   : > { %v1021_v40 = vmax.f32 %v992_v38, 0.0 }
 0x16b   : > { %v1033_v41 = vpack.c.bf16 %v1021_v40, %v1020_v39 }
 0x16c   : > { %v945_v42 = vpop.f32.mrf.mxu2 }
 0x16d   : > { %v994_v43 = vpop.f32.mrf.mxu3  ;;  %1129 = vmatmul.bf16.gmra.mxu0 %v1033_v41  ;;  %v946_v44 = vadd.f32 %v3153_v3, %v945_v42 }
 0x16f   : > { %v995_v46 = vadd.f32 %v994_v43, %v946_v44 }
 0x171   : > { %v1022_v50 = vmax.f32 %v995_v46, 0.0 }
 0x174   : > { %v947_v45 = vpop.f32.mrf.mxu2 }
 0x175   : > { %v948_v47 = vadd.f32 %v3153_v3, %v947_v45  ;;  %v996_v48 = vpop.f32.mrf.mxu3 }
 0x177   : > { %v997_v49 = vadd.f32 %v996_v48, %v948_v47 }
 0x179   : > { %v1023_v51 = vmax.f32 %v997_v49, 0.0 }
 0x17b   : > { %v1034_v52 = vpack.c.bf16 %v1023_v51, %v1022_v50 }
 0x17c   : > { %v950_v53 = vpop.f32.mrf.mxu2 }
 0x17d   : > { %v999_v54 = vpop.f32.mrf.mxu3  ;;  %1134 = vmatmul.bf16.gmra.mxu0 %v1034_v52  ;;  %v951_v55 = vadd.f32 %v3153_v3, %v950_v53  ;;  %v2696_v52 = vld [vmem:[%s3601_s8] sm:$0xff] }
 0x17e   : > { %1367 = vmatpush.bf16.msrb.mxu1 %v2696_v52  ;;  %v1155_v52 = vld [vmem:[%s3312_s24] sm:$0xff] }
 0x17f   : > { %v1000_v57 = vadd.f32 %v999_v54, %v951_v55 }
 0x181   : > { %v1024_v61 = vmax.f32 %v1000_v57, 0.0 }
 0x184   : > { %v952_v56 = vpop.f32.mrf.mxu2 }
 0x185   : > { %v953_v58 = vadd.f32 %v3153_v3, %v952_v56  ;;  %v1001_v59 = vpop.f32.mrf.mxu3 }
 0x187   : > { %v1002_v60 = vadd.f32 %v1001_v59, %v953_v58 }
 0x189   : > { %v1025_v4 = vmax.f32 %v1002_v60, 0.0 }
 0x18b   : > { %v1035_v62 = vpack.c.bf16 %v1025_v4, %v1024_v61 }
 0x18c   : > { %v955_v63 = vpop.f32.mrf.mxu2 }
 0x18d   : > { %v1004_v0 = vpop.f32.mrf.mxu3  ;;  %1139 = vmatmul.bf16.gmra.mxu0 %v1035_v62  ;;  %v956_v1 = vadd.f32 %v3153_v3, %v955_v63 }
 0x18f   : > { %v1005_v5 = vadd.f32 %v1004_v0, %v956_v1 }
 0x191   : > { %v1026_v9 = vmax.f32 %v1005_v5, 0.0 }
 0x194   : > { %v957_v2 = vpop.f32.mrf.mxu2 }
 0x195   : > { %v958_v6 = vadd.f32 %v3153_v3, %v957_v2  ;;  %v1006_v7 = vpop.f32.mrf.mxu3 }
 0x197   : > { %v1007_v8 = vadd.f32 %v1006_v7, %v958_v6 }
 0x199   : > { %v1027_v10 = vmax.f32 %v1007_v8, 0.0 }
 0x19b   : > { %v1036_v11 = vpack.c.bf16 %v1027_v10, %v1026_v9 }
 0x19c   : > { %v960_v12 = vpop.f32.mrf.mxu2 }
 0x19d   : > { %v1009_v13 = vpop.f32.mrf.mxu3  ;;  %1144 = vmatmul.bf16.gmra.mxu0 %v1036_v11  ;;  %v961_v14 = vadd.f32 %v3153_v3, %v960_v12 }
 0x19f   : > { %v1010_v16 = vadd.f32 %v1009_v13, %v961_v14 }
 0x1a1   : > { %v1028_v20 = vmax.f32 %v1010_v16, 0.0 }
 0x1a4   : > { %v962_v15 = vpop.f32.mrf.mxu2 }
 0x1a5   : > { %v963_v17 = vadd.f32 %v3153_v3, %v962_v15  ;;  %v1011_v18 = vpop.f32.mrf.mxu3 }
 0x1a7   : > { %v1012_v19 = vadd.f32 %v1011_v18, %v963_v17 }
 0x1a9   : > { %v1029_v21 = vmax.f32 %v1012_v19, 0.0 }
 0x1ab   : > { %v1037_v22 = vpack.c.bf16 %v1029_v21, %v1028_v20 }
 0x1ad   : > { %1149 = vmatmul.bf16.gmra.mxu0 %v1037_v22 }
 0x1ba   : > { %v1115_v24 = vpop.f32.mrf.mxu0 }
 0x1bb   : > { %v3183_v3 = vadd.f32 %v3174_v23, %v1115_v24 }
 0x1bd   : > { %v1171_v25 = vmul.f32 0.5, %v3183_v3  ;;  %2231 = vst [vmem:[%s3180_s29] sm:$0xff] %v3183_v3 }
 0x1bf   : > { %v1187_v26 = vmul.f32 1.442695, %v1171_v25 }
 0x1c1   : > { %2758 = vpow2.f32 %v1187_v26 }
 0x1c2   : > { %v1117_v27 = vpop.f32.mrf.mxu0 }
 0x1c3   : > { %v3189_v28 = vadd.f32 %v3174_v23, %v1117_v27 }
 0x1c5   : > { %v1172_v29 = vmul.f32 0.5, %v3189_v28  ;;  %2232 = vst [vmem:[%s3180_s29 + $0x8] sm:$0xff] %v3189_v28 }
 0x1c7   : > { %v2759_v30 = vpop.eup %2758  ;;  %v1189_v31 = vmul.f32 1.442695, %v1172_v29 }
 0x1c8   : > { %1235 = vrot.lane.b32.xlu0 %v2759_v30, %s2862_s23 }
 0x1c9   : > { %2760 = vpow2.f32 %v1189_v31 }
 0x1ca   : > { %v1120_v32 = vpop.f32.mrf.mxu0 }
 0x1cb   : > { %v3196_v33 = vadd.f32 %v3174_v23, %v1120_v32 }
 0x1cd   : > { %v1173_v34 = vmul.f32 0.5, %v3196_v33  ;;  %2233 = vst [vmem:[%s3180_s29 + $0x10] sm:$0xff] %v3196_v33 }
 0x1cf   : > { %v2761_v35 = vpop.eup %2760  ;;  %v1191_v36 = vmul.f32 1.442695, %v1173_v34 }
 0x1d0   : > { %1237 = vrot.lane.b32.xlu0 %v2761_v35, %s2862_s23 }
 0x1d1   : > { %2762 = vpow2.f32 %v1191_v36 }
 0x1d2   : > { %v1122_v37 = vpop.f32.mrf.mxu0 }
 0x1d3   : > { %v3203_v38 = vadd.f32 %v3174_v23, %v1122_v37 }
 0x1d5   : > { %v1174_v39 = vmul.f32 0.5, %v3203_v38  ;;  %2234 = vst [vmem:[%s3180_s29 + $0x18] sm:$0xff] %v3203_v38 }
 0x1d7   : > { %v2763_v40 = vpop.eup %2762  ;;  %v1193_v41 = vmul.f32 1.442695, %v1174_v39 }
 0x1d8   : > { %1239 = vrot.lane.b32.xlu1 %v2763_v40, %s2862_s23 }
 0x1d9   : > { %2764 = vpow2.f32 %v1193_v41 }
 0x1da   : > { %v1125_v42 = vpop.f32.mrf.mxu0 }
 0x1db   : > { %v3210_v43 = vadd.f32 %v3174_v23, %v1125_v42  ;;  %v2576_v42 = vld [vmem:[%s3603_s10 + $0x70] sm:$0xf] }
 0x1dd   : > { %v1175_v44 = vmul.f32 0.5, %v3210_v43  ;;  %2235 = vst [vmem:[%s3180_s29 + $0x20] sm:$0xff] %v3210_v43 }
 0x1df   : > { %v2765_v45 = vpop.eup %2764  ;;  %v1195_v46 = vmul.f32 1.442695, %v1175_v44  ;;  %v2712_v44 = vld [vmem:[%s3603_s10 + $0x74] sm:$0xf0] }
 0x1e0   : > { %1241 = vrot.lane.b32.xlu1 %v2765_v45, %s2862_s23  ;;  %v2577_v45 = vor.u32 %v2712_v44, %v2576_v42 }
 0x1e1   : > { %2766 = vpow2.f32 %v1195_v46 }
 0x1e2   : > { %v1127_v47 = vpop.f32.mrf.mxu0  ;;  %1535 = vmatpush.bf16.msra.mxu2 %v2577_v45  ;;  %v1162_v45 = vld [vmem:[%s3312_s24 + $0x38] sm:$0xff] }
 0x1e3   : > { %v3217_v48 = vadd.f32 %v3174_v23, %v1127_v47 }
 0x1e5   : > { %v1176_v49 = vmul.f32 0.5, %v3217_v48  ;;  %2236 = vst [vmem:[%s3180_s29 + $0x28] sm:$0xff] %v3217_v48 }
 0x1e7   : > { %v2767_v50 = vpop.eup %2766  ;;  %v1197_v51 = vmul.f32 1.442695, %v1176_v49  ;;  %v2578_v49 = vld [vmem:[%s3603_s10 + $0x78] sm:$0xf0] }
 0x1e8   : > { %1243 = vrot.lane.b32.xlu2 %v2767_v50, %s2862_s23 }
 0x1e9   : > { %2768 = vpow2.f32 %v1197_v51 }
 0x1ea   : > { %v1130_v53 = vpop.f32.mrf.mxu0 }
 0x1eb   : > { %v3227_v54 = vadd.f32 %v3174_v23, %v1130_v53 }
 0x1ed   : > { %v1177_v55 = vmul.f32 0.5, %v3227_v54  ;;  %2237 = vst [vmem:[%s3180_s29 + $0x30] sm:$0xff] %v3227_v54 }
 0x1ef   : > { %v2769_v56 = vpop.eup %2768  ;;  %v1199_v57 = vmul.f32 1.442695, %v1177_v55  ;;  %v1156_v55 = vld [vmem:[%s3312_s24 + $0x8] sm:$0xff] }
 0x1f0   : > { %1245 = vrot.lane.b32.xlu2 %v2769_v56, %s2862_s23 }
 0x1f1   : > { %2770 = vpow2.f32 %v1199_v57 }
 0x1f2   : > { %v1132_v58 = vpop.f32.mrf.mxu0 }
 0x1f3   : > { %v3234_v59 = vadd.f32 %v3174_v23, %v1132_v58 }
 0x1f5   : > { %v1178_v60 = vmul.f32 0.5, %v3234_v59  ;;  %2238 = vst [vmem:[%s3180_s29 + $0x38] sm:$0xff] %v3234_v59 }
 0x1f7   : > { %v2771_v61 = vpop.eup %2770  ;;  %v1201_v4 = vmul.f32 1.442695, %v1178_v60 }
 0x1f8   : > { %1247 = vrot.lane.b32.xlu0 %v2771_v61, %s2862_s23 }
 0x1f9   : > { %2772 = vpow2.f32 %v1201_v4  ;;  %v2568_v4 = vld [vmem:[%s3603_s10 + $0x60] sm:$0xf] }
 0x1fa   : > { %v1135_v62 = vpop.f32.mrf.mxu0 }
 0x1fb   : > { %v3241_v63 = vadd.f32 %v3174_v23, %v1135_v62  ;;  %v2710_v62 = vld [vmem:[%s3603_s10 + $0x64] sm:$0xf0] }
 0x1fd   : > { %v1179_v0 = vmul.f32 0.5, %v3241_v63  ;;  %2239 = vst [vmem:[%s3180_s29 + $0x40] sm:$0xff] %v3241_v63 }
 0x1ff   : > { %v2773_v1 = vpop.eup %2772  ;;  %v1203_v2 = vmul.f32 1.442695, %v1179_v0  ;;  %v2569_v0 = vor.u32 %v2710_v62, %v2568_v4 }
 0x200   : > { %1249 = vrot.lane.b32.xlu1 %v2773_v1, %s2862_s23 }
 0x201   : > { %2774 = vpow2.f32 %v1203_v2  ;;  %1536 = vmatpush.bf16.msra.mxu2 %v2569_v0 }
 0x202   : > { %v1137_v5 = vpop.f32.mrf.mxu0 }
 0x203   : > { %v3248_v6 = vadd.f32 %v3174_v23, %v1137_v5  ;;  %v1157_v5 = vld [vmem:[%s3312_s24 + $0x10] sm:$0xff] }
 0x205   : > { %v1180_v7 = vmul.f32 0.5, %v3248_v6  ;;  %2240 = vst [vmem:[%s3180_s29 + $0x48] sm:$0xff] %v3248_v6 }
 0x207   : > { %v2775_v8 = vpop.eup %2774  ;;  %v1205_v9 = vmul.f32 1.442695, %v1180_v7 }
 0x208   : > { %1251 = vrot.lane.b32.xlu2 %v2775_v8, %s2862_s23  ;;  %v1158_v8 = vld [vmem:[%s3312_s24 + $0x18] sm:$0xff] }
 0x209   : > { %2776 = vpow2.f32 %v1205_v9 }
 0x20a   : > { %v1140_v10 = vpop.f32.mrf.mxu0 }
 0x20b   : > { %v3255_v11 = vadd.f32 %v3174_v23, %v1140_v10 }
 0x20d   : > { %v1181_v12 = vmul.f32 0.5, %v3255_v11  ;;  %2241 = vst [vmem:[%s3180_s29 + $0x50] sm:$0xff] %v3255_v11 }
 0x20f   : > { %v2777_v13 = vpop.eup %2776  ;;  %v1207_v14 = vmul.f32 1.442695, %v1181_v12 }
 0x210   : > { %1253 = vrot.lane.b32.xlu0 %v2777_v13, %s2862_s23 }
 0x211   : > { %2778 = vpow2.f32 %v1207_v14 }
 0x212   : > { %v1142_v15 = vpop.f32.mrf.mxu0 }
 0x213   : > { %v3262_v16 = vadd.f32 %v3174_v23, %v1142_v15 }
 0x215   : > { %v1182_v17 = vmul.f32 0.5, %v3262_v16  ;;  %2242 = vst [vmem:[%s3180_s29 + $0x58] sm:$0xff] %v3262_v16 }
 0x217   : > { %v2779_v18 = vpop.eup %2778  ;;  %v1209_v19 = vmul.f32 1.442695, %v1182_v17  ;;  %v2560_v17 = vld [vmem:[%s3603_s10 + $0x50] sm:$0xf] }
 0x218   : > { %1255 = vrot.lane.b32.xlu1 %v2779_v18, %s2862_s23  ;;  %v2708_v18 = vld [vmem:[%s3603_s10 + $0x54] sm:$0xf0] }
 0x219   : > { %2780 = vpow2.f32 %v1209_v19  ;;  %v2561_v19 = vor.u32 %v2708_v18, %v2560_v17  ;;  %v2528_v18 = vld [vmem:[%s3603_s10 + $0x10] sm:$0xf] }
 0x21a   : > { %v1145_v20 = vpop.f32.mrf.mxu0 }
 0x21b   : > { %v3269_v21 = vadd.f32 %v3174_v23, %v1145_v20  ;;  %1537 = vmatpush.bf16.msra.mxu2 %v2561_v19  ;;  %v2700_v19 = vld [vmem:[%s3603_s10 + $0x14] sm:$0xf0] }
 0x21d   : > { %v1183_v22 = vmul.f32 0.5, %v3269_v21  ;;  %2243 = vst [vmem:[%s3180_s29 + $0x60] sm:$0xff] %v3269_v21 }
 0x21f   : > { %v2781_v24 = vpop.eup %2780  ;;  %v1211_v25 = vmul.f32 1.442695, %v1183_v22  ;;  %v1160_v22 = vld [vmem:[%s3312_s24 + $0x28] sm:$0xff] }
 0x220   : > { %1257 = vrot.lane.b32.xlu2 %v2781_v24, %s2862_s23 }
 0x221   : > { %2782 = vpow2.f32 %v1211_v25  ;;  %v1159_v25 = vld [vmem:[%s3312_s24 + $0x20] sm:$0xff] }
 0x222   : > { %v1147_v26 = vpop.f32.mrf.mxu0 }
 0x223   : > { %v3276_v27 = vadd.f32 %v3174_v23, %v1147_v26 }
 0x225   : > { %v1184_v29 = vmul.f32 0.5, %v3276_v27  ;;  %2244 = vst [vmem:[%s3180_s29 + $0x68] sm:$0xff] %v3276_v27 }
 0x227   : > { %v2783_v30 = vpop.eup %2782  ;;  %v1213_v31 = vmul.f32 1.442695, %v1184_v29 }
 0x228   : > { %1259 = vrot.lane.b32.xlu0 %v2783_v30, %s2862_s23 }
 0x229   : > { %2784 = vpow2.f32 %v1213_v31 }
 0x22a   : > { %v1150_v32 = vpop.f32.mrf.mxu0 }
 0x22b   : > { %v3283_v34 = vadd.f32 %v3174_v23, %v1150_v32 }
 0x22d   : > { %v1185_v35 = vmul.f32 0.5, %v3283_v34  ;;  %2245 = vst [vmem:[%s3180_s29 + $0x70] sm:$0xff] %v3283_v34 }
 0x22f   : > { %v2785_v36 = vpop.eup %2784  ;;  %v1215_v37 = vmul.f32 1.442695, %v1185_v35  ;;  %v2552_v35 = vld [vmem:[%s3603_s10 + $0x40] sm:$0xf] }
 0x230   : > { %1261 = vrot.lane.b32.xlu1 %v2785_v36, %s2862_s23  ;;  %v2706_v36 = vld [vmem:[%s3603_s10 + $0x44] sm:$0xf0] }
 0x231   : > { %2786 = vpow2.f32 %v1215_v37  ;;  %v2553_v37 = vor.u32 %v2706_v36, %v2552_v35 }
 0x232   : > { %v1152_v39 = vpop.f32.mrf.mxu0 }
 0x233   : > { %v3290_v40 = vadd.f32 %v3174_v23, %v1152_v39  ;;  %v2711_v23 = vld [vmem:[%s3603_s10 + $0x74] sm:$0xf]  ;;  %1538 = vmatpush.bf16.msra.mxu2 %v2553_v37 }
 0x234   : > { %v2581_v51 = vor.u32 %v2711_v23, %v2578_v49 }
 0x235   : > { %v1186_v41 = vmul.f32 0.5, %v3290_v40  ;;  %2246 = vst [vmem:[%s3180_s29 + $0x78] sm:$0xff] %v3290_v40 }
 0x236   : > { %1584 = vmatpush.bf16.msra.mxu3 %v2581_v51  ;;  %v2544_v51 = vld [vmem:[%s3603_s10 + $0x30] sm:$0xf] }
 0x237   : > { %v2787_v46 = vpop.eup %2786  ;;  %v1217_v47 = vmul.f32 1.442695, %v1186_v41  ;;  %v2705_v41 = vld [vmem:[%s3603_s10 + $0x44] sm:$0xf] }
 0x238   : > { %1263 = vrot.lane.b32.xlu2 %v2787_v46, %s2862_s23 }
 0x239   : > { %2788 = vpow2.f32 %v1217_v47 }
 0x23a   : > { %v1236_v50 = vpop.permute.xlu0 %1235 }
 0x23b   : > { %v1283_v56 = vmul.f32 %v1236_v50, %v1155_v52  ;;  %v2704_v52 = vld [vmem:[%s3603_s10 + $0x34] sm:$0xf0] }
 0x23d   : > { %v1299_v60 = vadd.f32 %v1283_v56, %v3183_v3  ;;  %v2709_v3 = vld [vmem:[%s3603_s10 + $0x64] sm:$0xf]  ;;  %v2703_v56 = vld [vmem:[%s3603_s10 + $0x34] sm:$0xf] }
 0x23f   : > { %v2789_v53 = vpop.eup %2788 }
 0x240   : > { %1265 = vrot.lane.b32.xlu0 %v2789_v53, %s2862_s23  ;;  %v2545_v53 = vor.u32 %v2704_v52, %v2544_v51  ;;  %v3442_v51 = vld [vmem:[%s3602_s9] ss:$0 sm:$0xff] }
 0x242   : > { %v1238_v57 = vpop.permute.xlu0 %1237  ;;  %v1244_v10 = vpop.permute.xlu2 %1243  ;;  %1539 = vmatpush.bf16.msra.mxu2 %v2545_v53 }
 0x243   : > { %v1284_v58 = vmul.f32 %v1238_v57, %v1156_v55  ;;  %v1287_v30 = vmul.f32 %v1244_v10, %v1159_v25  ;;  %v1166_v10 = vld [vmem:[%s3312_s24 + $0x58] sm:$0xff] }
 0x245   : > { %v1300_v61 = vadd.f32 %v1284_v58, %v3189_v28  ;;  %v2570_v28 = vld [vmem:[%s3603_s10 + $0x68] sm:$0xf0]  ;;  %v1303_v32 = vadd.f32 %v1287_v30, %v3210_v43 }
 0x246   : > { %v2573_v7 = vor.u32 %v2709_v3, %v2570_v28  ;;  %v2554_v43 = vld [vmem:[%s3603_s10 + $0x48] sm:$0xf0]  ;;  %v2702_v3 = vld [vmem:[%s3603_s10 + $0x24] sm:$0xf0] }
 0x247   : > { %v1315_v1 = vpack.c.bf16 %v1300_v61, %v1299_v60  ;;  %v2557_v44 = vor.u32 %v2705_v41, %v2554_v43  ;;  %v1164_v60 = vld [vmem:[%s3312_s24 + $0x48] sm:$0xff]  ;;  %v2697_v41 = vld [vmem:[%s3603_s10 + $0x4] sm:$0xf] }
 0x248   : > { %1585 = vmatpush.bf16.msra.mxu3 %v2573_v7  ;;  %v2701_v7 = vld [vmem:[%s3603_s10 + $0x24] sm:$0xf]  ;;  %v1168_v30 = vld [vmem:[%s3312_s24 + $0x68] sm:$0xff] }
 0x249   : > { %2510 = vmatmul.msk.bf16.vlgmr.msrb.gmra.mxu1 %vm1335_vm1, %v1315_v1  ;;  %v2522_v43 = vld [vmem:[%s3603_s10 + $0x8] sm:$0xf0] }
 0x24a   : > { %v1240_v2 = vpop.permute.xlu1 %1239  ;;  %v1246_v24 = vpop.permute.xlu2 %1245 }
 0x24b   : > { %v1285_v9 = vmul.f32 %v1240_v2, %v1157_v5  ;;  %v1288_v29 = vmul.f32 %v1246_v24, %v1160_v22  ;;  %v2536_v2 = vld [vmem:[%s3603_s10 + $0x20] sm:$0xf] }
 0x24c   : > { %v2537_v28 = vor.u32 %v2702_v3, %v2536_v2  ;;  %v2520_v24 = vld [vmem:[%s3603_s10] sm:$0xf]  ;;  %v2719_v3 = vld [vmem:[%s3605_s12 + $0x30] sm:$0xff] }
 0x24d   : > { %v1301_v14 = vadd.f32 %v1285_v9, %v3196_v33  ;;  %v2707_v33 = vld [vmem:[%s3603_s10 + $0x54] sm:$0xf]  ;;  %v1304_v31 = vadd.f32 %v1288_v29, %v3217_v48 }
 0x24e   : > { %v1161_v48 = vld [vmem:[%s3312_s24 + $0x30] sm:$0xff]  ;;  %1540 = vmatpush.bf16.msra.mxu2 %v2537_v28 }
 0x24f   : > { %v1317_v39 = vpack.c.bf16 %v1304_v31, %v1303_v32 }
 0x252   : > { %v1242_v12 = vpop.permute.xlu1 %1241 }
 0x253   : > { %v1286_v13 = vmul.f32 %v1242_v12, %v1158_v8  ;;  %v1165_v8 = vld [vmem:[%s3312_s24 + $0x50] sm:$0xff] }
 0x255   : > { %v1302_v15 = vadd.f32 %v1286_v13, %v3203_v38  ;;  %v2562_v38 = vld [vmem:[%s3603_s10 + $0x58] sm:$0xf0] }
 0x256   : > { %v2565_v26 = vor.u32 %v2707_v33, %v2562_v38  ;;  %v2698_v38 = vld [vmem:[%s3603_s10 + $0x4] sm:$0xf0] }
 0x257   : > { %v1316_v20 = vpack.c.bf16 %v1302_v15, %v1301_v14  ;;  %v2521_v25 = vor.u32 %v2698_v38, %v2520_v24 }
 0x258   : > { %1586 = vmatpush.bf16.msra.mxu3 %v2565_v26  ;;  %v1167_v26 = vld [vmem:[%s3312_s24 + $0x60] sm:$0xff] }
 0x259   : > { %2511 = vmatmul.msk.bf16.gmra.mxu1 %vm1335_vm1, %v1316_v20  ;;  %v2529_v20 = vor.u32 %v2700_v19, %v2528_v18 }
 0x25b   : > { %1541 = vmatpush.bf16.msra.mxu2 %v2529_v20  ;;  %v2725_v20 = vld [vmem:[%s3605_s12 + $0x60] sm:$0xff] }
 0x25c   : > { %1587 = vmatpush.bf16.msra.mxu3 %v2557_v44 }
 0x25f   : > { %1542 = vmatpush.bf16.msra.mxu2 %v2521_v25 }
 0x262   : > { %v1252_v57 = vpop.permute.xlu2 %1251 }
 0x269   : > { %2512 = vmatmul.msk.bf16.gmra.mxu1 %vm1335_vm1, %v1317_v39 }
 0x26a   : > { %v1248_v42 = vpop.permute.xlu0 %1247 }
 0x26b   : > { %v1289_v46 = vmul.f32 %v1248_v42, %v1161_v48  ;;  %v2525_v48 = vor.u32 %v2697_v41, %v2522_v43  ;;  %v1169_v42 = vld [vmem:[%s3312_s24 + $0x70] sm:$0xff] }
 0x26c   : > { %v2723_v43 = vld [vmem:[%s3605_s12 + $0x50] sm:$0xff] }
 0x26d   : > { %v1305_v49 = vadd.f32 %v1289_v46, %v3227_v54  ;;  %v2546_v54 = vld [vmem:[%s3603_s10 + $0x38] sm:$0xf0] }
 0x26e   : > { %v2549_v58 = vor.u32 %v2703_v56, %v2546_v54 }
 0x270   : > { %1588 = vmatpush.bf16.msra.mxu3 %v2549_v58 }
 0x272   : > { %v1250_v47 = vpop.permute.xlu1 %1249 }
 0x273   : > { %v1290_v23 = vmul.f32 %v1250_v47, %v1162_v45  ;;  %v1170_v45 = vld [vmem:[%s3312_s24 + $0x78] sm:$0xff] }
 0x275   : > { %v1306_v50 = vadd.f32 %v1290_v23, %v3234_v59  ;;  %v1163_v59 = vld [vmem:[%s3312_s24 + $0x40] sm:$0xff] }
 0x276   : > { %v1291_v61 = vmul.f32 %v1252_v57, %v1163_v59  ;;  %v2720_v57 = vld [vmem:[%s3605_s12 + $0x38] sm:$0xff] }
 0x277   : > { %v1318_v55 = vpack.c.bf16 %v1306_v50, %v1305_v49  ;;  %1813 = vmatpush.bf16.msra.mxu0 %v2720_v57  ;;  %2737 = vmatpush.bf16.msrb.mxu2 %v2720_v57  ;;  %v1449_v57 = vld [vmem:[%s3604_s11] sm:$0x3] }
 0x278   : > { %v1307_v0 = vadd.f32 %v1291_v61, %v3241_v63  ;;  %v2538_v63 = vld [vmem:[%s3603_s10 + $0x28] sm:$0xf0] }
 0x279   : > { %2513 = vmatmul.msk.bf16.gmra.mxu1 %vm1335_vm1, %v1318_v55 }
 0x27a   : > { %v1258_v12 = vpop.permute.xlu2 %1257 }
 0x27b   : > { %v1294_v14 = vmul.f32 %v1258_v12, %v1166_v10  ;;  %1814 = vmatpush.bf16.msra.mxu0 %v2719_v3  ;;  %2738 = vmatpush.bf16.msrb.mxu2 %v2719_v3  ;;  %v2718_v12 = vld [vmem:[%s3605_s12 + $0x28] sm:$0xff] }
 0x27d   : > { %v1310_v17 = vadd.f32 %v1294_v14, %v3262_v16  ;;  %v2530_v16 = vld [vmem:[%s3603_s10 + $0x18] sm:$0xf0] }
 0x27f   : > { %1815 = vmatpush.bf16.msra.mxu0 %v2718_v12  ;;  %2739 = vmatpush.bf16.msrb.mxu2 %v2718_v12 }
 0x282   : > { %v1254_v4 = vpop.permute.xlu0 %1253 }
 0x283   : > { %v1292_v62 = vmul.f32 %v1254_v4, %v1164_v60 }
 0x285   : > { %v1308_v1 = vadd.f32 %v1292_v62, %v3248_v6  ;;  %v2541_v6 = vor.u32 %v2701_v7, %v2538_v63 }
 0x287   : > { %v1319_v5 = vpack.c.bf16 %v1308_v1, %v1307_v0  ;;  %1589 = vmatpush.bf16.msra.mxu3 %v2541_v6  ;;  %v2727_v0 = vld [vmem:[%s3605_s12 + $0x70] sm:$0xff] }
 0x289   : > { %2514 = vmatmul.msk.bf16.gmra.mxu1 %vm1335_vm1, %v1319_v5 }
 0x28a   : > { %v1256_v9 = vpop.permute.xlu1 %1255 }
 0x28b   : > { %v1293_v13 = vmul.f32 %v1256_v9, %v1165_v8  ;;  %v2726_v9 = vld [vmem:[%s3605_s12 + $0x68] sm:$0xff] }
 0x28d   : > { %v1309_v15 = vadd.f32 %v1293_v13, %v3255_v11  ;;  %v2699_v11 = vld [vmem:[%s3603_s10 + $0x14] sm:$0xf] }
 0x28e   : > { %v2533_v33 = vor.u32 %v2699_v11, %v2530_v16  ;;  %v2717_v11 = vld [vmem:[%s3605_s12 + $0x20] sm:$0xff] }
 0x28f   : > { %v1320_v22 = vpack.c.bf16 %v1310_v17, %v1309_v15  ;;  %1816 = vmatpush.bf16.msra.mxu0 %v2717_v11  ;;  %2740 = vmatpush.bf16.msrb.mxu2 %v2717_v11 }
 0x290   : > { %1590 = vmatpush.bf16.msra.mxu3 %v2533_v33 }
 0x292   : > { %v1264_v44 = vpop.permute.xlu2 %1263 }
 0x293   : > { %v1297_v46 = vmul.f32 %v1264_v44, %v1169_v42  ;;  %v2722_v44 = vld [vmem:[%s3605_s12 + $0x48] sm:$0xff] }
 0x294   : > { %1591 = vmatpush.bf16.msra.mxu3 %v2525_v48  ;;  %v2715_v48 = vld [vmem:[%s3605_s12 + $0x10] sm:$0xff] }
 0x299   : > { %2515 = vmatmul.msk.bf16.gmra.mxu1 %vm1335_vm1, %v1320_v22 }
 0x29a   : > { %v1260_v29 = vpop.permute.xlu0 %1259 }
 0x29b   : > { %v1295_v31 = vmul.f32 %v1260_v29, %v1167_v26  ;;  %v2724_v29 = vld [vmem:[%s3605_s12 + $0x58] sm:$0xff] }
 0x29d   : > { %v1311_v36 = vadd.f32 %v1295_v31, %v3269_v21  ;;  %v2716_v31 = vld [vmem:[%s3605_s12 + $0x18] sm:$0xff] }
 0x29e   : > { %1817 = vmatpush.bf16.msra.mxu0 %v2716_v31  ;;  %2741 = vmatpush.bf16.msrb.mxu2 %v2716_v31 }
 0x2a2   : > { %v1262_v32 = vpop.permute.xlu1 %1261  ;;  %1818 = vmatpush.bf16.msra.mxu0 %v2715_v48  ;;  %2742 = vmatpush.bf16.msrb.mxu2 %v2715_v48 }
 0x2a3   : > { %v1296_v35 = vmul.f32 %v1262_v32, %v1168_v30 }
 0x2a5   : > { %v1312_v37 = vadd.f32 %v1296_v35, %v3276_v27  ;;  %v1313_v27 = vadd.f32 %v1297_v46, %v3283_v34  ;;  %v2728_v34 = vld [vmem:[%s3605_s12 + $0x78] sm:$0xff] }
 0x2a6   : > { %1862 = vmatpush.bf16.msra.mxu1 %v2728_v34 }
 0x2a7   : > { %v1321_v39 = vpack.c.bf16 %v1312_v37, %v1311_v36 }
 0x2a9   : > { %2516 = vmatmul.msk.bf16.gmra.mxu1 %vm1335_vm1, %v1321_v39 }
 0x2aa   : > { %1863 = vmatpush.bf16.msra.mxu1 %v2727_v0 }
 0x2ae   : > { %1864 = vmatpush.bf16.msra.mxu1 %v2726_v9 }
 0x2b2   : > { %v1266_v21 = vpop.permute.xlu0 %1265  ;;  %1865 = vmatpush.bf16.msra.mxu1 %v2725_v20 }
 0x2b3   : > { %v1298_v47 = vmul.f32 %v1266_v21, %v1170_v45 }
 0x2b5   : > { %v1314_v23 = vadd.f32 %v1298_v47, %v3290_v40 }
 0x2b6   : > { %1866 = vmatpush.bf16.msra.mxu1 %v2724_v29 }
 0x2b7   : > { %v1322_v49 = vpack.c.bf16 %v1314_v23, %v1313_v27 }
 0x2b9   : > { %2517 = vmatmul.msk.bf16.gmra.mxu1 %vm1335_vm1, %v1322_v49 }
 0x2ba   : > { %1867 = vmatpush.bf16.msra.mxu1 %v2723_v43 }
 0x2be   : > { %1868 = vmatpush.bf16.msra.mxu1 %v2722_v44 }
 0x2c6   : > { %v1369_v50 = vpop.f32.mrf.mxu1 }
 0x2c7   : > { %v1370_v52 = vadd.f32 %v3442_v51, %v1369_v50  ;;  %v2714_v50 = vld [vmem:[%s3605_s12 + $0x8] sm:$0xff] }
 0x2c8   : > { %1819 = vmatpush.bf16.msra.mxu0 %v2714_v50  ;;  %2743 = vmatpush.bf16.msrb.mxu2 %v2714_v50 }
 0x2c9   : > { %v1409_v56 = vmax.f32 %v1370_v52, 0.0  ;;  %v2721_v52 = vld [vmem:[%s3605_s12 + $0x40] sm:$0xff] }
 0x2ca   : > { %1869 = vmatpush.bf16.msra.mxu1 %v2721_v52 }
 0x2ce   : > { %v1371_v53 = vpop.f32.mrf.mxu1 }
 0x2cf   : > { %v1372_v55 = vadd.f32 %v3442_v51, %v1371_v53 }
 0x2d1   : > { %v1410_v54 = vmax.f32 %v1372_v55, 0.0 }
 0x2d3   : > { %v1425_v40 = vpack.c.bf16 %v1410_v54, %v1409_v56 }
 0x2d5   : > { %1543 = vmatmul.bf16.vlgmr.msra.gmra.mxu2 %v1425_v40  ;;  %1592 = vmatmul.bf16.vlgmr.msra.gmra.mxu3 %v1425_v40 }
 0x2d6   : > { %v1374_v59 = vpop.f32.mrf.mxu1 }
 0x2d7   : > { %v1375_v58 = vadd.f32 %v3442_v51, %v1374_v59  ;;  %v2713_v59 = vld [vmem:[%s3605_s12] sm:$0xff] }
 0x2d8   : > { %1820 = vmatpush.bf16.msra.mxu0 %v2713_v59  ;;  %2744 = vmatpush.bf16.msrb.mxu2 %v2713_v59 }
 0x2d9   : > { %v1411_v4 = vmax.f32 %v1375_v58, 0.0 }
 0x2de   : > { %v1376_v60 = vpop.f32.mrf.mxu1 }
 0x2df   : > { %v1377_v61 = vadd.f32 %v3442_v51, %v1376_v60 }
 0x2e1   : > { %v1412_v62 = vmax.f32 %v1377_v61, 0.0  ;;  %v3511_v61 = vperm.slane %v1449_v57, 0 }
 0x2e3   : > { %v1426_v1 = vpack.c.bf16 %v1412_v62, %v1411_v4 }
 0x2e5   : > { %1548 = vmatmul.bf16.gmra.mxu2 %v1426_v1  ;;  %1597 = vmatmul.bf16.gmra.mxu3 %v1426_v1 }
 0x2e6   : > { %v1379_v2 = vpop.f32.mrf.mxu1 }
 0x2e7   : > { %v1380_v28 = vadd.f32 %v3442_v51, %v1379_v2 }
 0x2e9   : > { %v1413_v63 = vmax.f32 %v1380_v28, 0.0 }
 0x2ee   : > { %v1381_v5 = vpop.f32.mrf.mxu1 }
 0x2ef   : > { %v1382_v7 = vadd.f32 %v3442_v51, %v1381_v5 }
 0x2f1   : > { %v1414_v6 = vmax.f32 %v1382_v7, 0.0 }
 0x2f3   : > { %v1427_v8 = vpack.c.bf16 %v1414_v6, %v1413_v63 }
 0x2f5   : > { %1553 = vmatmul.bf16.gmra.mxu2 %v1427_v8  ;;  %1602 = vmatmul.bf16.gmra.mxu3 %v1427_v8 }
 0x2f6   : > { %v1384_v10 = vpop.f32.mrf.mxu1 }
 0x2f7   : > { %v1385_v13 = vadd.f32 %v3442_v51, %v1384_v10 }
 0x2f9   : > { %v1415_v17 = vmax.f32 %v1385_v13, 0.0 }
 0x2fe   : > { %v1386_v14 = vpop.f32.mrf.mxu1 }
 0x2ff   : > { %v1387_v15 = vadd.f32 %v3442_v51, %v1386_v14 }
 0x301   : > { %v1416_v18 = vmax.f32 %v1387_v15, 0.0 }
 0x303   : > { %v1428_v19 = vpack.c.bf16 %v1416_v18, %v1415_v17 }
 0x305   : > { %1558 = vmatmul.bf16.gmra.mxu2 %v1428_v19  ;;  %1607 = vmatmul.bf16.gmra.mxu3 %v1428_v19 }
 0x306   : > { %v1389_v22 = vpop.f32.mrf.mxu1 }
 0x307   : > { %v1390_v16 = vadd.f32 %v3442_v51, %v1389_v22 }
 0x309   : > { %v1417_v38 = vmax.f32 %v1390_v16, 0.0 }
 0x30e   : > { %v1391_v24 = vpop.f32.mrf.mxu1 }
 0x30f   : > { %v1392_v33 = vadd.f32 %v3442_v51, %v1391_v24 }
 0x311   : > { %v1418_v25 = vmax.f32 %v1392_v33, 0.0 }
 0x313   : > { %v1429_v26 = vpack.c.bf16 %v1418_v25, %v1417_v38 }
 0x315   : > { %1563 = vmatmul.bf16.gmra.mxu2 %v1429_v26  ;;  %1612 = vmatmul.bf16.gmra.mxu3 %v1429_v26 }
 0x316   : > { %v1394_v30 = vpop.f32.mrf.mxu1 }
 0x317   : > { %v1395_v32 = vadd.f32 %v3442_v51, %v1394_v30 }
 0x319   : > { %v1419_v37 = vmax.f32 %v1395_v32, 0.0 }
 0x31e   : > { %v1396_v35 = vpop.f32.mrf.mxu1 }
 0x31f   : > { %v1397_v36 = vadd.f32 %v3442_v51, %v1396_v35 }
 0x321   : > { %v1420_v39 = vmax.f32 %v1397_v36, 0.0 }
 0x323   : > { %v1430_v41 = vpack.c.bf16 %v1420_v39, %v1419_v37 }
 0x325   : > { %1568 = vmatmul.bf16.gmra.mxu2 %v1430_v41  ;;  %1617 = vmatmul.bf16.gmra.mxu3 %v1430_v41 }
 0x326   : > { %v1399_v42 = vpop.f32.mrf.mxu1 }
 0x327   : > { %v1400_v45 = vadd.f32 %v3442_v51, %v1399_v42 }
 0x329   : > { %v1421_v47 = vmax.f32 %v1400_v45, 0.0 }
 0x32e   : > { %v1401_v46 = vpop.f32.mrf.mxu1 }
 0x32f   : > { %v1402_v21 = vadd.f32 %v3442_v51, %v1401_v46 }
 0x331   : > { %v1422_v27 = vmax.f32 %v1402_v21, 0.0 }
 0x333   : > { %v1431_v23 = vpack.c.bf16 %v1422_v27, %v1421_v47 }
 0x335   : > { %1573 = vmatmul.bf16.gmra.mxu2 %v1431_v23  ;;  %1622 = vmatmul.bf16.gmra.mxu3 %v1431_v23 }
 0x336   : > { %v1404_v49 = vpop.f32.mrf.mxu1 }
 0x337   : > { %v1405_v53 = vadd.f32 %v3442_v51, %v1404_v49 }
 0x339   : > { %v1423_v54 = vmax.f32 %v1405_v53, 0.0 }
 0x33e   : > { %v1406_v55 = vpop.f32.mrf.mxu1 }
 0x33f   : > { %v1407_v56 = vadd.f32 %v3442_v51, %v1406_v55  ;;  %v3513_v51 = vperm.slane %v1449_v57, 1 }
 0x341   : > { %v1424_v34 = vmax.f32 %v1407_v56, 0.0 }
 0x343   : > { %v1432_v40 = vpack.c.bf16 %v1424_v34, %v1423_v54 }
 0x345   : > { %1578 = vmatmul.bf16.gmra.mxu2 %v1432_v40  ;;  %1627 = vmatmul.bf16.gmra.mxu3 %v1432_v40 }
 0x358   : > { %v1544_v58 = vpop.f32.mrf.mxu2  ;;  %v1593_v60 = vpop.f32.mrf.mxu3 }
 0x359   : > { %v1545_v4 = vadd.f32 %v1544_v58, %v3511_v61  ;;  %v1594_v62 = vadd.f32 %v1593_v60, %v3513_v51 }
 0x35b   : > { %v1633_v28 = vmax.f32 %v1545_v4, 0.0  ;;  %v1634_v5 = vmax.f32 %v1594_v62, 0.0 }
 0x360   : > { %v1546_v0 = vpop.f32.mrf.mxu2  ;;  %v1595_v1 = vpop.f32.mrf.mxu3 }
 0x361   : > { %v1547_v2 = vadd.f32 %v1546_v0, %v3511_v61  ;;  %v1596_v3 = vadd.f32 %v1595_v1, %v3513_v51 }
 0x363   : > { %v1635_v7 = vmax.f32 %v1547_v2, 0.0  ;;  %v1636_v63 = vmax.f32 %v1596_v3, 0.0 }
 0x365   : > { %v1665_v6 = vpack.c.bf16 %v1635_v7, %v1633_v28  ;;  %v1666_v8 = vpack.c.bf16 %v1636_v63, %v1634_v5 }
 0x367   : > { %1821 = vmatmul.bf16.vlgmr.msra.gmra.mxu0 %v1665_v6  ;;  %1870 = vmatmul.bf16.vlgmr.msra.gmra.mxu1 %v1666_v8 }
 0x368   : > { %v1549_v9 = vpop.f32.mrf.mxu2  ;;  %v1598_v10 = vpop.f32.mrf.mxu3 }
 0x369   : > { %v1550_v12 = vadd.f32 %v1549_v9, %v3511_v61  ;;  %v1599_v13 = vadd.f32 %v1598_v10, %v3513_v51 }
 0x36b   : > { %v1637_v19 = vmax.f32 %v1550_v12, 0.0  ;;  %v1638_v20 = vmax.f32 %v1599_v13, 0.0 }
 0x370   : > { %v1551_v14 = vpop.f32.mrf.mxu2  ;;  %v1600_v15 = vpop.f32.mrf.mxu3 }
 0x371   : > { %v1552_v17 = vadd.f32 %v1551_v14, %v3511_v61  ;;  %v1601_v18 = vadd.f32 %v1600_v15, %v3513_v51 }
 0x373   : > { %v1639_v22 = vmax.f32 %v1552_v17, 0.0  ;;  %v1640_v11 = vmax.f32 %v1601_v18, 0.0 }
 0x375   : > { %v1667_v16 = vpack.c.bf16 %v1639_v22, %v1637_v19  ;;  %v1668_v24 = vpack.c.bf16 %v1640_v11, %v1638_v20 }
 0x377   : > { %1826 = vmatmul.bf16.gmra.mxu0 %v1667_v16  ;;  %1875 = vmatmul.bf16.gmra.mxu1 %v1668_v24 }
 0x378   : > { %v1554_v33 = vpop.f32.mrf.mxu2  ;;  %v1603_v38 = vpop.f32.mrf.mxu3 }
 0x379   : > { %v1555_v25 = vadd.f32 %v1554_v33, %v3511_v61  ;;  %v1604_v26 = vadd.f32 %v1603_v38, %v3513_v51 }
 0x37b   : > { %v1641_v35 = vmax.f32 %v1555_v25, 0.0  ;;  %v1642_v36 = vmax.f32 %v1604_v26, 0.0 }
 0x380   : > { %v1556_v29 = vpop.f32.mrf.mxu2  ;;  %v1605_v30 = vpop.f32.mrf.mxu3 }
 0x381   : > { %v1557_v31 = vadd.f32 %v1556_v29, %v3511_v61  ;;  %v1606_v32 = vadd.f32 %v1605_v30, %v3513_v51 }
 0x383   : > { %v1643_v37 = vmax.f32 %v1557_v31, 0.0  ;;  %v1644_v39 = vmax.f32 %v1606_v32, 0.0 }
 0x385   : > { %v1669_v41 = vpack.c.bf16 %v1643_v37, %v1641_v35  ;;  %v1670_v43 = vpack.c.bf16 %v1644_v39, %v1642_v36 }
 0x387   : > { %1831 = vmatmul.bf16.gmra.mxu0 %v1669_v41  ;;  %1880 = vmatmul.bf16.gmra.mxu1 %v1670_v43 }
 0x388   : > { %v1559_v48 = vpop.f32.mrf.mxu2  ;;  %v1608_v42 = vpop.f32.mrf.mxu3 }
 0x389   : > { %v1560_v44 = vadd.f32 %v1559_v48, %v3511_v61  ;;  %v1609_v45 = vadd.f32 %v1608_v42, %v3513_v51 }
 0x38b   : > { %v1645_v23 = vmax.f32 %v1560_v44, 0.0  ;;  %v1646_v49 = vmax.f32 %v1609_v45, 0.0 }
 0x390   : > { %v1561_v46 = vpop.f32.mrf.mxu2  ;;  %v1610_v21 = vpop.f32.mrf.mxu3 }
 0x391   : > { %v1562_v47 = vadd.f32 %v1561_v46, %v3511_v61  ;;  %v1611_v27 = vadd.f32 %v1610_v21, %v3513_v51 }
 0x393   : > { %v1647_v50 = vmax.f32 %v1562_v47, 0.0  ;;  %v1648_v52 = vmax.f32 %v1611_v27, 0.0 }
 0x395   : > { %v1671_v53 = vpack.c.bf16 %v1647_v50, %v1645_v23  ;;  %v1672_v55 = vpack.c.bf16 %v1648_v52, %v1646_v49  ;;  %v3550_v23 = vld [vmem:[%s3606_s13] ss:$0 sm:$0xff] }
 0x397   : > { %1836 = vmatmul.bf16.gmra.mxu0 %v1671_v53  ;;  %1885 = vmatmul.bf16.gmra.mxu1 %v1672_v55 }
 0x398   : > { %v1564_v56 = vpop.f32.mrf.mxu2  ;;  %v1613_v54 = vpop.f32.mrf.mxu3 }
 0x399   : > { %v1565_v34 = vadd.f32 %v1564_v56, %v3511_v61  ;;  %v1614_v40 = vadd.f32 %v1613_v54, %v3513_v51 }
 0x39b   : > { %v1649_v4 = vmax.f32 %v1565_v34, 0.0  ;;  %v1650_v62 = vmax.f32 %v1614_v40, 0.0 }
 0x3a0   : > { %v1566_v59 = vpop.f32.mrf.mxu2  ;;  %v1615_v57 = vpop.f32.mrf.mxu3 }
 0x3a1   : > { %v1567_v58 = vadd.f32 %v1566_v59, %v3511_v61  ;;  %v1616_v60 = vadd.f32 %v1615_v57, %v3513_v51 }
 0x3a3   : > { %v1651_v0 = vmax.f32 %v1567_v58, 0.0  ;;  %v1652_v1 = vmax.f32 %v1616_v60, 0.0 }
 0x3a5   : > { %v1673_v2 = vpack.c.bf16 %v1651_v0, %v1649_v4  ;;  %v1674_v3 = vpack.c.bf16 %v1652_v1, %v1650_v62 }
 0x3a7   : > { %1841 = vmatmul.bf16.gmra.mxu0 %v1673_v2  ;;  %1890 = vmatmul.bf16.gmra.mxu1 %v1674_v3 }
 0x3a8   : > { %v1569_v28 = vpop.f32.mrf.mxu2  ;;  %v1618_v5 = vpop.f32.mrf.mxu3 }
 0x3a9   : > { %v1570_v7 = vadd.f32 %v1569_v28, %v3511_v61  ;;  %v1619_v63 = vadd.f32 %v1618_v5, %v3513_v51 }
 0x3ab   : > { %v1653_v12 = vmax.f32 %v1570_v7, 0.0  ;;  %v1654_v13 = vmax.f32 %v1619_v63, 0.0 }
 0x3b0   : > { %v1571_v6 = vpop.f32.mrf.mxu2  ;;  %v1620_v8 = vpop.f32.mrf.mxu3 }
 0x3b1   : > { %v1572_v9 = vadd.f32 %v1571_v6, %v3511_v61  ;;  %v1621_v10 = vadd.f32 %v1620_v8, %v3513_v51 }
 0x3b3   : > { %v1655_v14 = vmax.f32 %v1572_v9, 0.0  ;;  %v1656_v15 = vmax.f32 %v1621_v10, 0.0 }
 0x3b5   : > { %v1675_v17 = vpack.c.bf16 %v1655_v14, %v1653_v12  ;;  %v1676_v18 = vpack.c.bf16 %v1656_v15, %v1654_v13 }
 0x3b7   : > { %1846 = vmatmul.bf16.gmra.mxu0 %v1675_v17  ;;  %1895 = vmatmul.bf16.gmra.mxu1 %v1676_v18 }
 0x3b8   : > { %v1574_v19 = vpop.f32.mrf.mxu2  ;;  %v1623_v20 = vpop.f32.mrf.mxu3 }
 0x3b9   : > { %v1575_v22 = vadd.f32 %v1574_v19, %v3511_v61  ;;  %v1624_v11 = vadd.f32 %v1623_v20, %v3513_v51 }
 0x3bb   : > { %v1657_v25 = vmax.f32 %v1575_v22, 0.0  ;;  %v1658_v26 = vmax.f32 %v1624_v11, 0.0 }
 0x3c0   : > { %v1576_v16 = vpop.f32.mrf.mxu2  ;;  %v1625_v24 = vpop.f32.mrf.mxu3 }
 0x3c1   : > { %v1577_v33 = vadd.f32 %v1576_v16, %v3511_v61  ;;  %v1626_v38 = vadd.f32 %v1625_v24, %v3513_v51 }
 0x3c3   : > { %v1659_v29 = vmax.f32 %v1577_v33, 0.0  ;;  %v1660_v30 = vmax.f32 %v1626_v38, 0.0 }
 0x3c5   : > { %v1677_v31 = vpack.c.bf16 %v1659_v29, %v1657_v25  ;;  %v1678_v32 = vpack.c.bf16 %v1660_v30, %v1658_v26 }
 0x3c7   : > { %1851 = vmatmul.bf16.gmra.mxu0 %v1677_v31  ;;  %1900 = vmatmul.bf16.gmra.mxu1 %v1678_v32 }
 0x3c8   : > { %v1579_v35 = vpop.f32.mrf.mxu2  ;;  %v1628_v36 = vpop.f32.mrf.mxu3 }
 0x3c9   : > { %v1580_v37 = vadd.f32 %v1579_v35, %v3511_v61  ;;  %v1629_v39 = vadd.f32 %v1628_v36, %v3513_v51 }
 0x3cb   : > { %v1661_v44 = vmax.f32 %v1580_v37, 0.0  ;;  %v1662_v45 = vmax.f32 %v1629_v39, 0.0 }
 0x3d0   : > { %v1581_v41 = vpop.f32.mrf.mxu2  ;;  %v1630_v43 = vpop.f32.mrf.mxu3 }
 0x3d1   : > { %v1582_v48 = vadd.f32 %v1581_v41, %v3511_v61  ;;  %v1631_v42 = vadd.f32 %v1630_v43, %v3513_v51 }
 0x3d3   : > { %v1663_v46 = vmax.f32 %v1582_v48, 0.0  ;;  %v1664_v21 = vmax.f32 %v1631_v42, 0.0 }
 0x3d5   : > { %v1679_v47 = vpack.c.bf16 %v1663_v46, %v1661_v44  ;;  %v1680_v27 = vpack.c.bf16 %v1664_v21, %v1662_v45 }
 0x3d7   : > { %1856 = vmatmul.bf16.vlgmr.msrb.gmra.mxu2 %v1679_v47  ;;  %1905 = vmatmul.bf16.gmra.mxu1 %v1680_v27 }
 0x3e4   : > { %v1822_v49 = vpop.f32.mrf.mxu0  ;;  %v1871_v50 = vpop.f32.mrf.mxu1 }
 0x3e5   : > { %v1823_v52 = vadd.f32 %v3550_v23, %v1822_v49 }
 0x3e7   : > { %v1872_v61 = vadd.f32 %v1871_v50, %v1823_v52 }
 0x3e9   : > { %v2646_v53 = vmul.f32 -1.442695, %v1872_v61 }
 0x3eb   : > { %2790 = vpow2.f32 %v2646_v53 }
 0x3ec   : > { %v1824_v51 = vpop.f32.mrf.mxu0  ;;  %v1873_v55 = vpop.f32.mrf.mxu1 }
 0x3ed   : > { %v1825_v56 = vadd.f32 %v3550_v23, %v1824_v51 }
 0x3ef   : > { %v1874_v54 = vadd.f32 %v1873_v55, %v1825_v56 }
 0x3f1   : > { %v2791_v34 = vpop.eup %2790  ;;  %v2647_v40 = vmul.f32 -1.442695, %v1874_v54 }
 0x3f2   : > { %v1959_v59 = vadd.f32 1.0, %v2791_v34 }
 0x3f3   : > { %2792 = vpow2.f32 %v2647_v40 }
 0x3f4   : > { %2794 = vrcp.f32 %v1959_v59  ;;  %v1827_v57 = vpop.f32.mrf.mxu0  ;;  %v1876_v58 = vpop.f32.mrf.mxu1  ;;  %v1986_v6 = vand.u32 2147483648, %v1959_v59  ;;  %v1984_v9 = vand.u32 2147483647, %v1959_v59  ;;  %vm1980_vm3 = vweird.f32 %v1959_v59 }
 0x3f5   : > { %v1828_v60 = vadd.f32 %v3550_v23, %v1827_v57 }
 0x3f6   : > { %v1987_v17 = vor.u32 1.1754944e-38, %v1986_v6  ;;  %vm1985_vm5 = vcmp.eq.f32.partialorder %v1984_v9, 8.507059e+37 }
 0x3f7   : > { %v1877_v4 = vadd.f32 %v1876_v58, %v1828_v60 }
 0x3f9   : > { %v2793_v62 = vpop.eup %2792  ;;  %v2648_v0 = vmul.f32 -1.442695, %v1877_v4 }
 0x3fa   : > { %v2795_v1 = vpop.eup %2794  ;;  %v1960_v2 = vadd.f32 1.0, %v2793_v62 }
 0x3fb   : > { %v1976_v3 = vmul.f32 %v2795_v1, %v1959_v59  ;;  %2796 = vpow2.f32 %v2648_v0  ;;  %vm1981_vm2 = vweird.f32 %v2795_v1 }
 0x3fc   : > { %2798 = vrcp.f32 %v1960_v2  ;;  %v1829_v28 = vpop.f32.mrf.mxu0  ;;  %v1878_v5 = vpop.f32.mrf.mxu1  ;;  %vm1982_vm4 = vmor %vm1980_vm3, %vm1981_vm2  ;;  %v2001_v38 = vand.u32 2147483648, %v1960_v2  ;;  %v1999_v26 = vand.u32 2147483647, %v1960_v2  ;;  %vm1995_vm7 = vweird.f32 %v1960_v2 }
 0x3fd   : > { %v1977_v7 = vsub.f32 1.0, %v1976_v3  ;;  %v1830_v63 = vadd.f32 %v3550_v23, %v1829_v28 }
 0x3fe   : > { %v2002_v36 = vor.u32 1.1754944e-38, %v2001_v38  ;;  %vm2000_vm9 = vcmp.eq.f32.partialorder %v1999_v26, 8.507059e+37 }
 0x3ff   : > { %v1978_v8 = vmul.f32 %v2795_v1, %v1977_v7  ;;  %v1879_v10 = vadd.f32 %v1878_v5, %v1830_v63 }
 0x401   : > { %v2797_v12 = vpop.eup %2796  ;;  %v1979_v13 = vadd.f32 %v2795_v1, %v1978_v8  ;;  %v2649_v14 = vmul.f32 -1.442695, %v1879_v10 }
 0x402   : > { %v2799_v15 = vpop.eup %2798  ;;  %v1961_v18 = vadd.f32 1.0, %v2797_v12 }
 0x403   : > { %v1983_v19 = vsel %vm1982_vm4, %v2795_v1, %v1979_v13  ;;  %v1991_v20 = vmul.f32 %v2799_v15, %v1960_v2  ;;  %2800 = vpow2.f32 %v2649_v14  ;;  %vm1996_vm6 = vweird.f32 %v2799_v15 }
 0x404   : > { %v1988_v22 = vsel %vm1985_vm5, %v1987_v17, %v1983_v19  ;;  %2802 = vrcp.f32 %v1961_v18  ;;  %v1832_v11 = vpop.f32.mrf.mxu0  ;;  %v1881_v16 = vpop.f32.mrf.mxu1  ;;  %vm1997_vm8 = vmor %vm1995_vm7, %vm1996_vm6  ;;  %v2016_v46 = vand.u32 2147483648, %v1961_v18  ;;  %v2014_v47 = vand.u32 2147483647, %v1961_v18 }
 0x405   : > { %2215 = vst [vmem:[%s3560_s21] sm:$0xff] %v1988_v22  ;;  %v1992_v24 = vsub.f32 1.0, %v1991_v20  ;;  %v1833_v33 = vadd.f32 %v3550_v23, %v1832_v11  ;;  %vm2010_vm11 = vweird.f32 %v1961_v18 }
 0x406   : > { %v2017_v53 = vor.u32 1.1754944e-38, %v2016_v46  ;;  %vm2015_vm13 = vcmp.eq.f32.partialorder %v2014_v47, 8.507059e+37 }
 0x407   : > { %v1993_v25 = vmul.f32 %v2799_v15, %v1992_v24  ;;  %v1882_v29 = vadd.f32 %v1881_v16, %v1833_v33 }
 0x409   : > { %v2801_v30 = vpop.eup %2800  ;;  %v1994_v31 = vadd.f32 %v2799_v15, %v1993_v25  ;;  %v2650_v32 = vmul.f32 -1.442695, %v1882_v29 }
 0x40a   : > { %v2803_v35 = vpop.eup %2802  ;;  %v1962_v37 = vadd.f32 1.0, %v2801_v30 }
 0x40b   : > { %v1998_v39 = vsel %vm1997_vm8, %v2799_v15, %v1994_v31  ;;  %v2006_v41 = vmul.f32 %v2803_v35, %v1961_v18  ;;  %2804 = vpow2.f32 %v2650_v32  ;;  %vm2011_vm10 = vweird.f32 %v2803_v35 }
 0x40c   : > { %v2003_v43 = vsel %vm2000_vm9, %v2002_v36, %v1998_v39  ;;  %2806 = vrcp.f32 %v1962_v37  ;;  %v1834_v48 = vpop.f32.mrf.mxu0  ;;  %v1883_v42 = vpop.f32.mrf.mxu1  ;;  %vm2012_vm12 = vmor %vm2010_vm11, %vm2011_vm10  ;;  %v2031_v58 = vand.u32 2147483648, %v1962_v37  ;;  %v2029_v4 = vand.u32 2147483647, %v1962_v37 }
 0x40d   : > { %2216 = vst [vmem:[%s3560_s21 + $0x8] sm:$0xff] %v2003_v43  ;;  %v2007_v44 = vsub.f32 1.0, %v2006_v41  ;;  %v1835_v45 = vadd.f32 %v3550_v23, %v1834_v48  ;;  %vm2025_vm15 = vweird.f32 %v1962_v37 }
 0x40e   : > { %v2032_v28 = vor.u32 1.1754944e-38, %v2031_v58  ;;  %vm2030_vm1 = vcmp.eq.f32.partialorder %v2029_v4, 8.507059e+37 }
 0x40f   : > { %v2008_v21 = vmul.f32 %v2803_v35, %v2007_v44  ;;  %v1884_v27 = vadd.f32 %v1883_v42, %v1835_v45 }
 0x411   : > { %v2805_v49 = vpop.eup %2804  ;;  %v2009_v50 = vadd.f32 %v2803_v35, %v2008_v21  ;;  %v2651_v52 = vmul.f32 -1.442695, %v1884_v27 }
 0x412   : > { %v2807_v61 = vpop.eup %2806  ;;  %v1963_v51 = vadd.f32 1.0, %v2805_v49 }
 0x413   : > { %v2013_v55 = vsel %vm2012_vm12, %v2803_v35, %v2009_v50  ;;  %v2021_v56 = vmul.f32 %v2807_v61, %v1962_v37  ;;  %2808 = vpow2.f32 %v2651_v52  ;;  %vm2026_vm14 = vweird.f32 %v2807_v61 }
 0x414   : > { %v2018_v54 = vsel %vm2015_vm13, %v2017_v53, %v2013_v55  ;;  %2810 = vrcp.f32 %v1963_v51  ;;  %v1837_v34 = vpop.f32.mrf.mxu0  ;;  %v1886_v40 = vpop.f32.mrf.mxu1  ;;  %vm2027_vm0 = vmor %vm2025_vm15, %vm2026_vm14  ;;  %v2046_v13 = vand.u32 2147483648, %v1963_v51  ;;  %v2044_v15 = vand.u32 2147483647, %v1963_v51 }
 0x415   : > { %2217 = vst [vmem:[%s3560_s21 + $0x10] sm:$0xff] %v2018_v54  ;;  %v2022_v59 = vsub.f32 1.0, %v2021_v56  ;;  %v1838_v57 = vadd.f32 %v3550_v23, %v1837_v34  ;;  %vm2040_vm3 = vweird.f32 %v1963_v51 }
 0x416   : > { %v2047_v11 = vor.u32 1.1754944e-38, %v2046_v13  ;;  %vm2045_vm5 = vcmp.eq.f32.partialorder %v2044_v15, 8.507059e+37 }
 0x417   : > { %v2023_v60 = vmul.f32 %v2807_v61, %v2022_v59  ;;  %v1887_v62 = vadd.f32 %v1886_v40, %v1838_v57 }
 0x419   : > { %v2809_v0 = vpop.eup %2808  ;;  %v2024_v1 = vadd.f32 %v2807_v61, %v2023_v60  ;;  %v2652_v2 = vmul.f32 -1.442695, %v1887_v62 }
 0x41a   : > { %v2811_v3 = vpop.eup %2810  ;;  %v1964_v5 = vadd.f32 1.0, %v2809_v0 }
 0x41b   : > { %v2028_v7 = vsel %vm2027_vm0, %v2807_v61, %v2024_v1  ;;  %v2036_v63 = vmul.f32 %v2811_v3, %v1963_v51  ;;  %2812 = vpow2.f32 %v2652_v2  ;;  %vm2041_vm2 = vweird.f32 %v2811_v3 }
 0x41c   : > { %v2033_v6 = vsel %vm2030_vm1, %v2032_v28, %v2028_v7  ;;  %2814 = vrcp.f32 %v1964_v5  ;;  %v1839_v8 = vpop.f32.mrf.mxu0  ;;  %v1888_v9 = vpop.f32.mrf.mxu1  ;;  %vm2042_vm4 = vmor %vm2040_vm3, %vm2041_vm2  ;;  %v2061_v31 = vand.u32 2147483648, %v1964_v5  ;;  %v2059_v35 = vand.u32 2147483647, %v1964_v5 }
 0x41d   : > { %2218 = vst [vmem:[%s3560_s21 + $0x18] sm:$0xff] %v2033_v6  ;;  %v2037_v10 = vsub.f32 1.0, %v2036_v63  ;;  %v1840_v12 = vadd.f32 %v3550_v23, %v1839_v8  ;;  %vm2055_vm7 = vweird.f32 %v1964_v5 }
 0x41e   : > { %v2062_v48 = vor.u32 1.1754944e-38, %v2061_v31  ;;  %vm2060_vm9 = vcmp.eq.f32.partialorder %v2059_v35, 8.507059e+37 }
 0x41f   : > { %v2038_v14 = vmul.f32 %v2811_v3, %v2037_v10  ;;  %v1889_v17 = vadd.f32 %v1888_v9, %v1840_v12 }
 0x421   : > { %v2813_v18 = vpop.eup %2812  ;;  %v2039_v19 = vadd.f32 %v2811_v3, %v2038_v14  ;;  %v2653_v20 = vmul.f32 -1.442695, %v1889_v17 }
 0x422   : > { %v2815_v22 = vpop.eup %2814  ;;  %v1965_v16 = vadd.f32 1.0, %v2813_v18 }
 0x423   : > { %v2043_v24 = vsel %vm2042_vm4, %v2811_v3, %v2039_v19  ;;  %v2051_v33 = vmul.f32 %v2815_v22, %v1964_v5  ;;  %2816 = vpow2.f32 %v2653_v20  ;;  %vm2056_vm6 = vweird.f32 %v2815_v22 }
 0x424   : > { %v2048_v38 = vsel %vm2045_vm5, %v2047_v11, %v2043_v24  ;;  %2818 = vrcp.f32 %v1965_v16  ;;  %v1842_v25 = vpop.f32.mrf.mxu0  ;;  %v1891_v26 = vpop.f32.mrf.mxu1  ;;  %vm2057_vm8 = vmor %vm2055_vm7, %vm2056_vm6  ;;  %v2076_v50 = vand.u32 2147483648, %v1965_v16  ;;  %v2074_v61 = vand.u32 2147483647, %v1965_v16 }
 0x425   : > { %2219 = vst [vmem:[%s3560_s21 + $0x20] sm:$0xff] %v2048_v38  ;;  %v2052_v29 = vsub.f32 1.0, %v2051_v33  ;;  %v1843_v30 = vadd.f32 %v3550_v23, %v1842_v25  ;;  %vm2070_vm11 = vweird.f32 %v1965_v16 }
 0x426   : > { %v2077_v34 = vor.u32 1.1754944e-38, %v2076_v50  ;;  %vm2075_vm13 = vcmp.eq.f32.partialorder %v2074_v61, 8.507059e+37 }
 0x427   : > { %v2053_v32 = vmul.f32 %v2815_v22, %v2052_v29  ;;  %v1892_v36 = vadd.f32 %v1891_v26, %v1843_v30 }
 0x429   : > { %v2817_v37 = vpop.eup %2816  ;;  %v2054_v39 = vadd.f32 %v2815_v22, %v2053_v32  ;;  %v2654_v41 = vmul.f32 -1.442695, %v1892_v36 }
 0x42a   : > { %v2819_v43 = vpop.eup %2818  ;;  %v1966_v42 = vadd.f32 1.0, %v2817_v37 }
 0x42b   : > { %v2058_v44 = vsel %vm2057_vm8, %v2815_v22, %v2054_v39  ;;  %v2066_v45 = vmul.f32 %v2819_v43, %v1965_v16  ;;  %2820 = vpow2.f32 %v2654_v41  ;;  %vm2071_vm10 = vweird.f32 %v2819_v43 }
 0x42c   : > { %v2063_v46 = vsel %vm2060_vm9, %v2062_v48, %v2058_v44  ;;  %2822 = vrcp.f32 %v1966_v42  ;;  %v1844_v21 = vpop.f32.mrf.mxu0  ;;  %v1893_v47 = vpop.f32.mrf.mxu1  ;;  %vm2072_vm12 = vmor %vm2070_vm11, %vm2071_vm10  ;;  %v2091_v1 = vand.u32 2147483648, %v1966_v42  ;;  %v2089_v3 = vand.u32 2147483647, %v1966_v42 }
 0x42d   : > { %2220 = vst [vmem:[%s3560_s21 + $0x28] sm:$0xff] %v2063_v46  ;;  %v2067_v27 = vsub.f32 1.0, %v2066_v45  ;;  %v1845_v49 = vadd.f32 %v3550_v23, %v1844_v21  ;;  %vm2085_vm15 = vweird.f32 %v1966_v42 }
 0x42e   : > { %v2092_v8 = vor.u32 1.1754944e-38, %v2091_v1  ;;  %vm2090_vm1 = vcmp.eq.f32.partialorder %v2089_v3, 8.507059e+37 }
 0x42f   : > { %v2068_v52 = vmul.f32 %v2819_v43, %v2067_v27  ;;  %v1894_v53 = vadd.f32 %v1893_v47, %v1845_v49 }
 0x431   : > { %v2821_v51 = vpop.eup %2820  ;;  %v2069_v55 = vadd.f32 %v2819_v43, %v2068_v52  ;;  %v2655_v56 = vmul.f32 -1.442695, %v1894_v53 }
 0x432   : > { %v2823_v54 = vpop.eup %2822  ;;  %v1967_v40 = vadd.f32 1.0, %v2821_v51 }
 0x433   : > { %v2073_v59 = vsel %vm2072_vm12, %v2819_v43, %v2069_v55  ;;  %v2081_v57 = vmul.f32 %v2823_v54, %v1966_v42  ;;  %2824 = vpow2.f32 %v2655_v56  ;;  %vm2086_vm14 = vweird.f32 %v2823_v54 }
 0x434   : > { %v2078_v58 = vsel %vm2075_vm13, %v2077_v34, %v2073_v59  ;;  %2826 = vrcp.f32 %v1967_v40  ;;  %v1847_v60 = vpop.f32.mrf.mxu0  ;;  %v1896_v4 = vpop.f32.mrf.mxu1  ;;  %vm2087_vm0 = vmor %vm2085_vm15, %vm2086_vm14  ;;  %v2106_v19 = vand.u32 2147483648, %v1967_v40  ;;  %v2104_v22 = vand.u32 2147483647, %v1967_v40 }
 0x435   : > { %2221 = vst [vmem:[%s3560_s21 + $0x30] sm:$0xff] %v2078_v58  ;;  %v2082_v62 = vsub.f32 1.0, %v2081_v57  ;;  %v1848_v0 = vadd.f32 %v3550_v23, %v1847_v60  ;;  %vm2100_vm3 = vweird.f32 %v1967_v40 }
 0x436   : > { %v2107_v25 = vor.u32 1.1754944e-38, %v2106_v19  ;;  %vm2105_vm5 = vcmp.eq.f32.partialorder %v2104_v22, 8.507059e+37 }
 0x437   : > { %v2083_v2 = vmul.f32 %v2823_v54, %v2082_v62  ;;  %v1897_v28 = vadd.f32 %v1896_v4, %v1848_v0 }
 0x439   : > { %v2825_v5 = vpop.eup %2824  ;;  %v2084_v7 = vadd.f32 %v2823_v54, %v2083_v2  ;;  %v2656_v63 = vmul.f32 -1.442695, %v1897_v28 }
 0x43a   : > { %v2827_v6 = vpop.eup %2826  ;;  %v1968_v9 = vadd.f32 1.0, %v2825_v5 }
 0x43b   : > { %v2088_v10 = vsel %vm2087_vm0, %v2823_v54, %v2084_v7  ;;  %v2096_v12 = vmul.f32 %v2827_v6, %v1967_v40  ;;  %2828 = vpow2.f32 %v2656_v63  ;;  %vm2101_vm2 = vweird.f32 %v2827_v6 }
 0x43c   : > { %v2093_v13 = vsel %vm2090_vm1, %v2092_v8, %v2088_v10  ;;  %2830 = vrcp.f32 %v1968_v9  ;;  %v1849_v14 = vpop.f32.mrf.mxu0  ;;  %v1898_v15 = vpop.f32.mrf.mxu1  ;;  %vm2102_vm4 = vmor %vm2100_vm3, %vm2101_vm2  ;;  %v2121_v39 = vand.u32 2147483648, %v1968_v9  ;;  %v2119_v43 = vand.u32 2147483647, %v1968_v9 }
 0x43d   : > { %2222 = vst [vmem:[%s3560_s21 + $0x38] sm:$0xff] %v2093_v13  ;;  %v2097_v17 = vsub.f32 1.0, %v2096_v12  ;;  %v1850_v18 = vadd.f32 %v3550_v23, %v1849_v14  ;;  %vm2115_vm7 = vweird.f32 %v1968_v9 }
 0x43e   : > { %v2122_v21 = vor.u32 1.1754944e-38, %v2121_v39  ;;  %vm2120_vm9 = vcmp.eq.f32.partialorder %v2119_v43, 8.507059e+37 }
 0x43f   : > { %v2098_v20 = vmul.f32 %v2827_v6, %v2097_v17  ;;  %v1899_v11 = vadd.f32 %v1898_v15, %v1850_v18 }
 0x441   : > { %v2829_v16 = vpop.eup %2828  ;;  %v2099_v24 = vadd.f32 %v2827_v6, %v2098_v20  ;;  %v2657_v33 = vmul.f32 -1.442695, %v1899_v11 }
 0x442   : > { %v2831_v38 = vpop.eup %2830  ;;  %v1969_v26 = vadd.f32 1.0, %v2829_v16 }
 0x443   : > { %v2103_v29 = vsel %vm2102_vm4, %v2827_v6, %v2099_v24  ;;  %v2111_v30 = vmul.f32 %v2831_v38, %v1968_v9  ;;  %2832 = vpow2.f32 %v2657_v33  ;;  %vm2116_vm6 = vweird.f32 %v2831_v38 }
 0x444   : > { %v2108_v31 = vsel %vm2105_vm5, %v2107_v25, %v2103_v29  ;;  %2834 = vrcp.f32 %v1969_v26  ;;  %v1852_v32 = vpop.f32.mrf.mxu0  ;;  %v1901_v35 = vpop.f32.mrf.mxu1  ;;  %vm2117_vm8 = vmor %vm2115_vm7, %vm2116_vm6  ;;  %v2136_v51 = vand.u32 2147483648, %v1969_v26  ;;  %v2134_v54 = vand.u32 2147483647, %v1969_v26 }
 0x445   : > { %2223 = vst [vmem:[%s3560_s21 + $0x40] sm:$0xff] %v2108_v31  ;;  %v2112_v36 = vsub.f32 1.0, %v2111_v30  ;;  %v1853_v37 = vadd.f32 %v3550_v23, %v1852_v32  ;;  %vm2130_vm11 = vweird.f32 %v1969_v26 }
 0x446   : > { %v2137_v60 = vor.u32 1.1754944e-38, %v2136_v51  ;;  %vm2135_vm13 = vcmp.eq.f32.partialorder %v2134_v54, 8.507059e+37 }
 0x447   : > { %v2113_v41 = vmul.f32 %v2831_v38, %v2112_v36  ;;  %v1902_v48 = vadd.f32 %v1901_v35, %v1853_v37 }
 0x449   : > { %v2833_v42 = vpop.eup %2832  ;;  %v2114_v44 = vadd.f32 %v2831_v38, %v2113_v41  ;;  %v2658_v45 = vmul.f32 -1.442695, %v1902_v48 }
 0x44a   : > { %v2835_v46 = vpop.eup %2834  ;;  %v1970_v47 = vadd.f32 1.0, %v2833_v42 }
 0x44b   : > { %v2118_v27 = vsel %vm2117_vm8, %v2831_v38, %v2114_v44  ;;  %v2126_v49 = vmul.f32 %v2835_v46, %v1969_v26  ;;  %2836 = vpow2.f32 %v2658_v45  ;;  %vm2131_vm10 = vweird.f32 %v2835_v46 }
 0x44c   : > { %v2123_v50 = vsel %vm2120_vm9, %v2122_v21, %v2118_v27  ;;  %2838 = vrcp.f32 %v1970_v47  ;;  %v1854_v52 = vpop.f32.mrf.mxu0  ;;  %v1903_v55 = vpop.f32.mrf.mxu1  ;;  %vm2132_vm12 = vmor %vm2130_vm11, %vm2131_vm10  ;;  %v2151_v3 = vand.u32 2147483648, %v1970_v47  ;;  %v2149_v5 = vand.u32 2147483647, %v1970_v47 }
 0x44d   : > { %2224 = vst [vmem:[%s3560_s21 + $0x48] sm:$0xff] %v2123_v50  ;;  %v2127_v61 = vsub.f32 1.0, %v2126_v49  ;;  %v1855_v53 = vadd.f32 %v3550_v23, %v1854_v52  ;;  %vm2145_vm15 = vweird.f32 %v1970_v47 }
 0x44e   : > { %v2152_v8 = vor.u32 1.1754944e-38, %v2151_v3  ;;  %vm2150_vm1 = vcmp.eq.f32.partialorder %v2149_v5, 8.507059e+37 }
 0x44f   : > { %v2128_v56 = vmul.f32 %v2835_v46, %v2127_v61  ;;  %v1904_v34 = vadd.f32 %v1903_v55, %v1855_v53 }
 0x451   : > { %v2837_v40 = vpop.eup %2836  ;;  %v2129_v59 = vadd.f32 %v2835_v46, %v2128_v56  ;;  %v2659_v57 = vmul.f32 -1.442695, %v1904_v34 }
 0x452   : > { %v2839_v58 = vpop.eup %2838  ;;  %v1971_v4 = vadd.f32 1.0, %v2837_v40 }
 0x453   : > { %v2133_v62 = vsel %vm2132_vm12, %v2835_v46, %v2129_v59  ;;  %v2141_v0 = vmul.f32 %v2839_v58, %v1970_v47  ;;  %2840 = vpow2.f32 %v2659_v57  ;;  %vm2146_vm14 = vweird.f32 %v2839_v58 }
 0x454   : > { %v2138_v1 = vsel %vm2135_vm13, %v2137_v60, %v2133_v62  ;;  %2842 = vrcp.f32 %v1971_v4  ;;  %vm2147_vm0 = vmor %vm2145_vm15, %vm2146_vm14  ;;  %v1906_v10 = vpop.f32.mrf.mxu1  ;;  %v2166_v20 = vand.u32 2147483648, %v1971_v4  ;;  %v2164_v11 = vand.u32 2147483647, %v1971_v4 }
 0x455   : > { %2225 = vst [vmem:[%s3560_s21 + $0x50] sm:$0xff] %v2138_v1  ;;  %v2142_v2 = vsub.f32 1.0, %v2141_v0  ;;  %vm2160_vm3 = vweird.f32 %v1971_v4 }
 0x456   : > { %v2167_v38 = vor.u32 1.1754944e-38, %v2166_v20  ;;  %vm2165_vm5 = vcmp.eq.f32.partialorder %v2164_v11, 8.507059e+37 }
 0x457   : > { %v2143_v28 = vmul.f32 %v2839_v58, %v2142_v2 }
 0x459   : > { %v2841_v7 = vpop.eup %2840  ;;  %v2144_v63 = vadd.f32 %v2839_v58, %v2143_v28 }
 0x45a   : > { %v2843_v6 = vpop.eup %2842  ;;  %v1972_v9 = vadd.f32 1.0, %v2841_v7  ;;  %v1857_v12 = vpop.f32.mrf.mxu2 }
 0x45b   : > { %v2148_v13 = vsel %vm2147_vm0, %v2839_v58, %v2144_v63  ;;  %v2156_v14 = vmul.f32 %v2843_v6, %v1971_v4  ;;  %v1858_v15 = vadd.f32 %v3550_v23, %v1857_v12  ;;  %vm2161_vm2 = vweird.f32 %v2843_v6 }
 0x45c   : > { %v2153_v17 = vsel %vm2150_vm1, %v2152_v8, %v2148_v13  ;;  %2844 = vrcp.f32 %v1972_v9  ;;  %vm2162_vm4 = vmor %vm2160_vm3, %vm2161_vm2  ;;  %v1908_v32 = vpop.f32.mrf.mxu1  ;;  %v2181_v37 = vand.u32 2147483648, %v1972_v9  ;;  %v2179_v43 = vand.u32 2147483647, %v1972_v9 }
 0x45d   : > { %2226 = vst [vmem:[%s3560_s21 + $0x58] sm:$0xff] %v2153_v17  ;;  %v2157_v18 = vsub.f32 1.0, %v2156_v14  ;;  %v1907_v19 = vadd.f32 %v1906_v10, %v1858_v15  ;;  %vm2175_vm7 = vweird.f32 %v1972_v9 }
 0x45e   : > { %v2182_v45 = vor.u32 1.1754944e-38, %v2181_v37  ;;  %vm2180_vm9 = vcmp.eq.f32.partialorder %v2179_v43, 8.507059e+37 }
 0x45f   : > { %v2158_v22 = vmul.f32 %v2843_v6, %v2157_v18  ;;  %v2660_v16 = vmul.f32 -1.442695, %v1907_v19 }
 0x461   : > { %v2159_v24 = vadd.f32 %v2843_v6, %v2158_v22  ;;  %2846 = vpow2.f32 %v2660_v16 }
 0x462   : > { %v2845_v33 = vpop.eup %2844  ;;  %v1859_v25 = vpop.f32.mrf.mxu2 }
 0x463   : > { %v2163_v26 = vsel %vm2162_vm4, %v2843_v6, %v2159_v24  ;;  %v2171_v29 = vmul.f32 %v2845_v33, %v1972_v9  ;;  %v1860_v30 = vadd.f32 %v3550_v23, %v1859_v25  ;;  %vm2176_vm6 = vweird.f32 %v2845_v33 }
 0x464   : > { %v2168_v31 = vsel %vm2165_vm5, %v2167_v38, %v2163_v26  ;;  %vm2177_vm8 = vmor %vm2175_vm7, %vm2176_vm6 }
 0x465   : > { %2227 = vst [vmem:[%s3560_s21 + $0x60] sm:$0xff] %v2168_v31  ;;  %v2172_v35 = vsub.f32 1.0, %v2171_v29  ;;  %v1909_v36 = vadd.f32 %v1908_v32, %v1860_v30 }
 0x467   : > { %v2847_v39 = vpop.eup %2846  ;;  %v2173_v41 = vmul.f32 %v2845_v33, %v2172_v35  ;;  %v2661_v48 = vmul.f32 -1.442695, %v1909_v36 }
 0x468   : > { %v1973_v42 = vadd.f32 1.0, %v2847_v39 }
 0x469   : > { %v2174_v44 = vadd.f32 %v2845_v33, %v2173_v41  ;;  %2848 = vpow2.f32 %v2661_v48 }
 0x46a   : > { %2850 = vrcp.f32 %v1973_v42  ;;  %v2196_v52 = vand.u32 2147483648, %v1973_v42  ;;  %v2194_v53 = vand.u32 2147483647, %v1973_v42  ;;  %vm2190_vm11 = vweird.f32 %v1973_v42 }
 0x46b   : > { %v2178_v23 = vsel %vm2177_vm8, %v2845_v33, %v2174_v44 }
 0x46c   : > { %v2183_v46 = vsel %vm2180_vm9, %v2182_v45, %v2178_v23  ;;  %v2197_v56 = vor.u32 1.1754944e-38, %v2196_v52  ;;  %vm2195_vm13 = vcmp.eq.f32.partialorder %v2194_v53, 8.507059e+37 }
 0x46d   : > { %2228 = vst [vmem:[%s3560_s21 + $0x68] sm:$0xff] %v2183_v46 }
 0x46f   : > { %v2849_v21 = vpop.eup %2848 }
 0x470   : > { %v2851_v47 = vpop.eup %2850  ;;  %v1974_v27 = vadd.f32 1.0, %v2849_v21 }
 0x471   : > { %v2186_v49 = vmul.f32 %v2851_v47, %v1973_v42  ;;  %vm2191_vm10 = vweird.f32 %v2851_v47 }
 0x472   : > { %2852 = vrcp.f32 %v1974_v27  ;;  %vm2192_vm12 = vmor %vm2190_vm11, %vm2191_vm10  ;;  %v2211_v57 = vand.u32 2147483648, %v1974_v27  ;;  %v2209_v60 = vand.u32 2147483647, %v1974_v27  ;;  %vm2205_vm15 = vweird.f32 %v1974_v27 }
 0x473   : > { %v2187_v50 = vsub.f32 1.0, %v2186_v49 }
 0x474   : > { %v2212_v62 = vor.u32 1.1754944e-38, %v2211_v57  ;;  %vm2210_vm1 = vcmp.eq.f32.partialorder %v2209_v60, 8.507059e+37 }
 0x475   : > { %v2188_v61 = vmul.f32 %v2851_v47, %v2187_v50 }
 0x477   : > { %v2189_v51 = vadd.f32 %v2851_v47, %v2188_v61 }
 0x478   : > { %v2853_v55 = vpop.eup %2852 }
 0x479   : > { %v2193_v54 = vsel %vm2192_vm12, %v2851_v47, %v2189_v51  ;;  %v2201_v34 = vmul.f32 %v2853_v55, %v1974_v27  ;;  %vm2206_vm14 = vweird.f32 %v2853_v55 }
 0x47a   : > { %v2198_v40 = vsel %vm2195_vm13, %v2197_v56, %v2193_v54  ;;  %vm2207_vm0 = vmor %vm2205_vm15, %vm2206_vm14 }
 0x47b   : > { %2229 = vst [vmem:[%s3560_s21 + $0x70] sm:$0xff] %v2198_v40  ;;  %v2202_v59 = vsub.f32 1.0, %v2201_v34 }
 0x47d   : > { %v2203_v58 = vmul.f32 %v2853_v55, %v2202_v59 }
 0x47f   : > { %v2204_v4 = vadd.f32 %v2853_v55, %v2203_v58 }
 0x481   : > { %v2208_v0 = vsel %vm2207_vm0, %v2853_v55, %v2204_v4 }
 0x482   : > { %v2213_v1 = vsel %vm2210_vm1, %v2212_v62, %v2208_v0 }
 0x483   : > { %2230 = vst [vmem:[%s3560_s21 + $0x78] sm:$0xff] %v2213_v1 }
 0x484 PF: > { %s26_s18 = sadd.s32 1, %s2860_s18  }
 0x485   : > { %p23_p4 = scmp.ge.s32.totalorder %s26_s18, 4  }
 0x487   :  { %25 = sbr.rel (!%p23_p4) target bundleno = 1 (0x1), region = 121 }

</bundles_post_ra>
